<compile_context>
chip_gen: v7x
topology: tpu7x:2x2x1
jax: 0.10.0
libtpu: 0.0.40
codegen_flags: <defaults>
</compile_context>

<pallas_src>
import functools

import jax
import jax.numpy as jnp
from jax.experimental import pallas as pl
from jax.experimental.pallas import tpu as pltpu


# ----------------------------- in-kernel math -------------------------------

def _erf(x):
    # Abramowitz & Stegun 7.1.26 rational approximation (|err| <= 1.5e-7).
    # The divide uses an approximate EUP reciprocal + one Newton step, so the
    # VALU (the saturating slot under GELU) only sees mul/add/select.
    a1, a2, a3, a4, a5 = (0.254829592, -0.284496736, 1.421413741,
                          -1.453152027, 1.061405429)
    p = 0.3275911
    sgn = jnp.where(x >= 0.0, 1.0, -1.0)
    ax = jnp.abs(x)
    d = 1.0 + p * ax
    t = pl.reciprocal(d, approx=True)
    t = t * (2.0 - d * t)                     # Newton step -> ~full f32 accuracy
    poly = ((((a5 * t + a4) * t + a3) * t + a2) * t + a1) * t
    return sgn * (1.0 - poly * jnp.exp(-ax * ax))


def _gelu_exact(x):
    # Matches PyTorch F.gelu(approximate='none'): x * Phi(x)   (~1.5e-7 err).
    return 0.5 * x * (1.0 + _erf(x * 0.7071067811865476))


# ---------------- spectral conv (NCHW, FFT over minor axes) ------------------

def spectral_conv2d_nchw(x, w_block, modes1, modes2):
    """SpectralConv2d forward.  x: (B, C, H, W) f32 -> (B, Cout, H, W) f32.

    w_block: (2*modes1*modes2, 2*Cin, 2*Cout) real block weight covering BOTH
    mode bands (weights1 low H-rows, then weights2 high H-rows).
    """
    B, C, H, W = x.shape
    # TODO(synk): rfft2/irfft2 have no Pallas equivalent; they lower to the XLA
    # TPU FFT.  NCHW keeps (H, W) minor so no layout shuffles surround the FFT.
    x_ft = jnp.fft.rfft2(x, axes=(2, 3))               # (B, C, H, Wf) complex64
    Wf = W // 2 + 1
    Cout = w_block.shape[-1] // 2
    M = 2 * modes1 * modes2

    lo = x_ft[:, :, :modes1, :modes2]                   # (B, C, m1, m2)
    hi = x_ft[:, :, H - modes1:, :modes2]                # (B, C, m1, m2)
    xm = jnp.concatenate([lo, hi], axis=2)               # (B, C, 2m1, m2)
    xm = jnp.transpose(xm, (2, 3, 0, 1)).reshape(M, B, C)
    x_blk = jnp.concatenate([xm.real, xm.imag], axis=-1).astype(jnp.float32)

    # ~0.5 MFLOP batched (per-mode) complex mix in real block form:
    #   [xr xi] @ [[wr wi], [-wi wr]] = [yr yi].
    # Kept as one XLA einsum (fuses with the slicing/transposes); a Pallas call
    # here would be pure launch + (8,128)-padding overhead at these sizes.
    out = jnp.einsum('mbi,mio->mbo', x_blk, w_block)     # (M, B, 2*Cout)

    o_c = (out[..., :Cout] + 1j * out[..., Cout:]).astype(jnp.complex64)
    o_c = o_c.reshape(2 * modes1, modes2, B, Cout).transpose(2, 3, 0, 1)

    out_ft = jnp.zeros((B, Cout, H, Wf), dtype=jnp.complex64)
    out_ft = out_ft.at[:, :, :modes1, :modes2].set(o_c[:, :, :modes1])
    out_ft = out_ft.at[:, :, H - modes1:, :modes2].set(o_c[:, :, modes1:])
    return jnp.fft.irfft2(out_ft, s=(H, W), axes=(2, 3)).astype(x.dtype)


# --------------------------- Pallas tiling helper ----------------------------

def _spatial_tile(hw, batch):
    """Lane-dense spatial tile size (columns of the (C, HW) view).

    Keeps tiles <= 2048 columns and makes the (batch, tile) grid have >= 2
    parallel steps so v7x's two TensorCores both get work (neutral on 1-TC
    v5e/v6e)."""
    if hw > 2048:
        return 2048                              # multiple of 128; ragged tail OK
    if batch >= 2 or hw < 256:
        return hw                                # full extent: always legal block
    return max(128, ((hw // 2 + 127) // 128) * 128)


# ------------- fused conv1x1 + residual (+GELU) kernel (mid layers) ----------

def _fno_pointwise_kernel(x_ref, r_ref, w_ref, b_ref, o_ref, *, act):
    # x_ref, r_ref, o_ref: (C, TN)  w_ref: (Cout, Cin)  b_ref: (Cout, 1)
    z = jnp.dot(w_ref[...], x_ref[...], preferred_element_type=jnp.float32)
    z = z + b_ref[...] + r_ref[...]
    if act:
        z = _gelu_exact(z)
    o_ref[...] = z.astype(o_ref.dtype)


def fno_pointwise(x, residual, conv_w, conv_b, *, gelu):
    """act(conv_w @ x + conv_b + residual), transposed pointwise form.

    x, residual: (B, C, HW);  conv_w: (Cout, Cin) (PyTorch Conv2d 1x1 layout);
    conv_b: (Cout,).  Returns (B, Cout, HW)."""
    B, C, HW = x.shape
    Cout = conv_w.shape[0]
    TN = _spatial_tile(HW, B)
    grid = (B, pl.cdiv(HW, TN))
    kern = functools.partial(_fno_pointwise_kernel, act=gelu)
    return pl.pallas_call(
        kern,
        out_shape=jax.ShapeDtypeStruct((B, Cout, HW), x.dtype),
        grid=grid,
        in_specs=[
            pl.BlockSpec((None, C, TN), lambda b, j: (b, 0, j)),
            pl.BlockSpec((None, Cout, TN), lambda b, j: (b, 0, j)),
            pl.BlockSpec((Cout, C), lambda b, j: (0, 0)),
            pl.BlockSpec((Cout, 1), lambda b, j: (0, 0)),
        ],
        out_specs=pl.BlockSpec((None, Cout, TN), lambda b, j: (b, 0, j)),
        compiler_params=pltpu.CompilerParams(
            dimension_semantics=("parallel", "parallel")),
    )(x, residual, conv_w, conv_b.reshape(Cout, 1))


# ---------- fused (last conv1x1 + residual) -> fc1 -> GELU -> fc2 kernel -----

def _last_layer_head_kernel(x_ref, r_ref, cw_ref, cb_ref,
                            w1_ref, b1_ref, w2_ref, b2_ref, o_ref):
    # All operands in the (rows = channels, lanes = spatial) layout.
    z = jnp.dot(cw_ref[...], x_ref[...], preferred_element_type=jnp.float32)
    z = z + cb_ref[...] + r_ref[...]                       # last layer: no GELU
    h = jnp.dot(w1_ref[...], z, preferred_element_type=jnp.float32)
    h = _gelu_exact(h + b1_ref[...])
    o = jnp.dot(w2_ref[...], h, preferred_element_type=jnp.float32)
    o_ref[...] = (o + b2_ref[...]).astype(o_ref.dtype)     # lane-dense (5, TN)


def last_layer_and_head(x, residual, conv_w, conv_b, fc1_w, fc1_b, fc2_w, fc2_b):
    """Fused last FNO layer + decoder head.  Returns (B, 5, HW)."""
    B, C, HW = x.shape
    H1 = fc1_w.shape[0]       # 128
    N = fc2_w.shape[0]        # 5
    TN = _spatial_tile(HW, B)
    grid = (B, pl.cdiv(HW, TN))
    return pl.pallas_call(
        _last_layer_head_kernel,
        out_shape=jax.ShapeDtypeStruct((B, N, HW), x.dtype),
        grid=grid,
        in_specs=[
            pl.BlockSpec((None, C, TN), lambda b, j: (b, 0, j)),
            pl.BlockSpec((None, C, TN), lambda b, j: (b, 0, j)),
            pl.BlockSpec((C, C), lambda b, j: (0, 0)),
            pl.BlockSpec((C, 1), lambda b, j: (0, 0)),
            pl.BlockSpec((H1, C), lambda b, j: (0, 0)),
            pl.BlockSpec((H1, 1), lambda b, j: (0, 0)),
            pl.BlockSpec((N, H1), lambda b, j: (0, 0)),
            pl.BlockSpec((N, 1), lambda b, j: (0, 0)),
        ],
        out_specs=pl.BlockSpec((None, N, TN), lambda b, j: (b, 0, j)),
        compiler_params=pltpu.CompilerParams(
            dimension_semantics=("parallel", "parallel")),
    )(x, residual, conv_w, conv_b.reshape(C, 1),
      fc1_w, fc1_b.reshape(H1, 1), fc2_w, fc2_b.reshape(N, 1))


# ------------------------------ model forward --------------------------------

def state_de_forward(x_latent, params, *, modes1, modes2):
    """x_latent: (B, C, H, W) float32 (PyTorch NCHW) -> (B, H, W, 5)."""
    B, C, H, W = x_latent.shape
    HW = H * W
    x = x_latent
    for lp in params['layers'][:-1]:
        x1 = spectral_conv2d_nchw(x, lp['w_block'], modes1, modes2)
        x = fno_pointwise(x.reshape(B, C, HW), x1.reshape(B, C, HW),
                          lp['conv_w'], lp['conv_b'], gelu=True)
        x = x.reshape(B, C, H, W)
    lp = params['layers'][-1]
    x1 = spectral_conv2d_nchw(x, lp['w_block'], modes1, modes2)
    o = last_layer_and_head(x.reshape(B, C, HW), x1.reshape(B, C, HW),
                            lp['conv_w'], lp['conv_b'],
                            params['fc1_w'], params['fc1_b'],
                            params['fc2_w'], params['fc2_b'])       # (B, 5, HW)
    # Match the PyTorch output layout (B, H, W, 5).
    return jnp.transpose(o.reshape(B, 5, H, W), (0, 2, 3, 1))


# ------------------------------ parameter init -------------------------------

def _spectral_block_weight(w1, w2):
    """(Cin,Cout,m1,m2) complex x2 -> (2*m1*m2, 2*Cin, 2*Cout) real block weight."""
    Cin, Cout, m1, m2 = w1.shape
    w = jnp.concatenate([w1, w2], axis=2)                    # (Cin,Cout,2m1,m2)
    wt = jnp.transpose(w, (2, 3, 0, 1)).reshape(2 * m1 * m2, Cin, Cout)
    wr = jnp.real(wt).astype(jnp.float32)
    wi = jnp.imag(wt).astype(jnp.float32)
    top = jnp.concatenate([wr, wi], axis=-1)                 # (M, Cin, 2Cout)
    bot = jnp.concatenate([-wi, wr], axis=-1)                # (M, Cin, 2Cout)
    return jnp.concatenate([top, bot], axis=1)               # (M, 2Cin, 2Cout)


def init_params(key, modes1, modes2, width, L):
    layers = []
    scale = 1.0 / (width * width)
    for _ in range(L):
        key, k0, k1, k2, k3, k4, k5 = jax.random.split(key, 7)
        w1 = scale * (jax.random.uniform(k0, (width, width, modes1, modes2)) +
                      1j * jax.random.uniform(k1, (width, width, modes1, modes2)))
        w2 = scale * (jax.random.uniform(k2, (width, width, modes1, modes2)) +
                      1j * jax.random.uniform(k3, (width, width, modes1, modes2)))
        # Conv2d 1x1 weight in the PyTorch (Cout, Cin) layout — used as-is by
        # the transposed pointwise kernels (o = W @ x), so checkpoint loading
        # needs no transpose.
        conv_w = (jax.random.uniform(k4, (width, width),
                                     minval=-1.0, maxval=1.0) / width)
        conv_b = (jax.random.uniform(k5, (width,),
                                     minval=-1.0, maxval=1.0) / width)
        layers.append(dict(
            w_block=_spectral_block_weight(w1.astype(jnp.complex64),
                                           w2.astype(jnp.complex64)),
            conv_w=conv_w.astype(jnp.float32),
            conv_b=conv_b.astype(jnp.float32)))
    key, k1, k2, k3, k4 = jax.random.split(key, 5)
    # Linear weights in the PyTorch (out_features, in_features) layout.
    fc1_w = (jax.random.uniform(k1, (128, width), minval=-1.0, maxval=1.0)
             / jnp.sqrt(width)).astype(jnp.float32)
    fc1_b = (jax.random.uniform(k2, (128,), minval=-1.0, maxval=1.0)
             / jnp.sqrt(width)).astype(jnp.float32)
    fc2_w = (jax.random.uniform(k3, (5, 128), minval=-1.0, maxval=1.0)
             / jnp.sqrt(128.0)).astype(jnp.float32)
    fc2_b = (jax.random.uniform(k4, (5,), minval=-1.0, maxval=1.0)
             / jnp.sqrt(128.0)).astype(jnp.float32)
    return dict(layers=layers, fc1_w=fc1_w, fc1_b=fc1_b, fc2_w=fc2_w, fc2_b=fc2_b)


# ----------------------------------- main -------------------------------------

if __name__ == "__main__":
    modes1, modes2, width, L = 4, 4, 32, 2
    B, H, W = 2, 16, 16

    x_latent = jax.random.normal(jax.random.PRNGKey(0), (B, width, H, W),
                                 dtype=jnp.float32)
    params = init_params(jax.random.PRNGKey(1234), modes1, modes2, width, L)

    fwd = jax.jit(functools.partial(state_de_forward, modes1=modes1, modes2=modes2))
    out = fwd(x_latent, params)
    jax.block_until_ready(out)

    assert out.shape == (B, H, W, 5), out.shape
    assert out.dtype == jnp.float32
    assert bool(jnp.all(jnp.isfinite(out)))
    print("KERNEL_OK")
</pallas_src>

<mosaic_0001>
module attributes {stable_mosaic.version = 11 : i64} {
  func.func @_fno_pointwise_kernel(%arg0: i32, %arg1: i32, %arg2: memref<1x32x256xf32, #tpu.memory_space<vmem>>, %arg3: memref<1x32x256xf32, #tpu.memory_space<vmem>>, %arg4: memref<32x32xf32, #tpu.memory_space<vmem>>, %arg5: memref<32x1xf32, #tpu.memory_space<vmem>>, %arg6: memref<1x32x256xf32, #tpu.memory_space<vmem>>) attributes {dimension_semantics = [#tpu.dimension_semantics<parallel>, #tpu.dimension_semantics<parallel>], iteration_bounds = array<i64: 2, 1>, scalar_prefetch = 0 : i64, scratch_operands = 0 : i64, tpu.core_type = #tpu.core_type<tc>, window_params = [{transform_indices = @transform_0, window_bounds = array<i64: 1, 32, 256>}, {transform_indices = @transform_1, window_bounds = array<i64: 1, 32, 256>}, {pipeline_mode = #tpu.pipeline_mode<synchronous>, transform_indices = @transform_2, window_bounds = array<i64: 32, 32>}, {pipeline_mode = #tpu.pipeline_mode<synchronous>, transform_indices = @transform_3, window_bounds = array<i64: 32, 1>}, {transform_indices = @transform_4, window_bounds = array<i64: 1, 32, 256>}]} {
    %c0 = arith.constant 0 : index
    %c0_0 = arith.constant 0 : index
    %0 = vector.load %arg4[%c0, %c0_0] : memref<32x32xf32, #tpu.memory_space<vmem>>, vector<32x32xf32>
    %c0_1 = arith.constant 0 : index
    %c0_2 = arith.constant 0 : index
    %c0_3 = arith.constant 0 : index
    %1 = vector.load %arg2[%c0_1, %c0_2, %c0_3] : memref<1x32x256xf32, #tpu.memory_space<vmem>>, vector<1x32x256xf32>
    %2 = vector.shape_cast %1 : vector<1x32x256xf32> to vector<32x256xf32>
    %cst = arith.constant dense<0.000000e+00> : vector<32x256xf32>
    %3 = tpu.matmul %0, %2, %cst {dimension_numbers = #tpu.dot_dimension_numbers<[1], [0], [0], [1], [0, 0, 1, 1], [], []>} : vector<32x32xf32>, vector<32x256xf32>, vector<32x256xf32> -> vector<32x256xf32>
    %c0_4 = arith.constant 0 : index
    %c0_5 = arith.constant 0 : index
    %4 = vector.load %arg5[%c0_4, %c0_5] : memref<32x1xf32, #tpu.memory_space<vmem>>, vector<32x1xf32>
    %5 = vector.broadcast %4 : vector<32x1xf32> to vector<32x256xf32>
    %6 = arith.addf %3, %5 : vector<32x256xf32>
    %c0_6 = arith.constant 0 : index
    %c0_7 = arith.constant 0 : index
    %c0_8 = arith.constant 0 : index
    %7 = vector.load %arg3[%c0_6, %c0_7, %c0_8] : memref<1x32x256xf32, #tpu.memory_space<vmem>>, vector<1x32x256xf32>
    %8 = vector.shape_cast %7 : vector<1x32x256xf32> to vector<32x256xf32>
    %9 = arith.addf %6, %8 : vector<32x256xf32>
    %cst_9 = arith.constant 5.000000e-01 : f32
    %10 = vector.broadcast %cst_9 : f32 to vector<32x256xf32>
    %11 = arith.mulf %10, %9 : vector<32x256xf32>
    %cst_10 = arith.constant 0.707106769 : f32
    %12 = vector.broadcast %cst_10 : f32 to vector<32x256xf32>
    %13 = arith.mulf %9, %12 : vector<32x256xf32>
    %cst_11 = arith.constant 0.000000e+00 : f32
    %14 = vector.broadcast %cst_11 : f32 to vector<32x256xf32>
    %15 = arith.cmpf oge, %13, %14 : vector<32x256xf32>
    %cst_12 = arith.constant 1.000000e+00 : f32
    %cst_13 = arith.constant -1.000000e+00 : f32
    %16 = vector.broadcast %cst_12 : f32 to vector<32x256xf32>
    %17 = vector.broadcast %cst_13 : f32 to vector<32x256xf32>
    %18 = arith.select %15, %16, %17 : vector<32x256xi1>, vector<32x256xf32>
    %19 = math.absf %13 : vector<32x256xf32>
    %cst_14 = arith.constant 0.327591091 : f32
    %20 = vector.broadcast %cst_14 : f32 to vector<32x256xf32>
    %21 = arith.mulf %20, %19 : vector<32x256xf32>
    %cst_15 = arith.constant 1.000000e+00 : f32
    %22 = vector.broadcast %cst_15 : f32 to vector<32x256xf32>
    %23 = arith.addf %22, %21 : vector<32x256xf32>
    %24 = tpu.reciprocal %23 {approx = true} : vector<32x256xf32> -> vector<32x256xf32>
    %25 = arith.mulf %23, %24 : vector<32x256xf32>
    %cst_16 = arith.constant 2.000000e+00 : f32
    %26 = vector.broadcast %cst_16 : f32 to vector<32x256xf32>
    %27 = arith.subf %26, %25 : vector<32x256xf32>
    %28 = arith.mulf %24, %27 : vector<32x256xf32>
    %cst_17 = arith.constant 1.06140542 : f32
    %29 = vector.broadcast %cst_17 : f32 to vector<32x256xf32>
    %30 = arith.mulf %29, %28 : vector<32x256xf32>
    %cst_18 = arith.constant -1.45315206 : f32
    %31 = vector.broadcast %cst_18 : f32 to vector<32x256xf32>
    %32 = arith.addf %30, %31 : vector<32x256xf32>
    %33 = arith.mulf %32, %28 : vector<32x256xf32>
    %cst_19 = arith.constant 1.42141378 : f32
    %34 = vector.broadcast %cst_19 : f32 to vector<32x256xf32>
    %35 = arith.addf %33, %34 : vector<32x256xf32>
    %36 = arith.mulf %35, %28 : vector<32x256xf32>
    %cst_20 = arith.constant -0.284496725 : f32
    %37 = vector.broadcast %cst_20 : f32 to vector<32x256xf32>
    %38 = arith.addf %36, %37 : vector<32x256xf32>
    %39 = arith.mulf %38, %28 : vector<32x256xf32>
    %cst_21 = arith.constant 0.254829586 : f32
    %40 = vector.broadcast %cst_21 : f32 to vector<32x256xf32>
    %41 = arith.addf %39, %40 : vector<32x256xf32>
    %42 = arith.mulf %41, %28 : vector<32x256xf32>
    %cst_22 = arith.constant 0.000000e+00 : f32
    %43 = vector.broadcast %cst_22 : f32 to vector<32x256xf32>
    %44 = arith.subf %43, %19 : vector<32x256xf32>
    %45 = arith.mulf %44, %19 : vector<32x256xf32>
    %46 = math.exp %45 : vector<32x256xf32>
    %47 = arith.mulf %42, %46 : vector<32x256xf32>
    %cst_23 = arith.constant 1.000000e+00 : f32
    %48 = vector.broadcast %cst_23 : f32 to vector<32x256xf32>
    %49 = arith.subf %48, %47 : vector<32x256xf32>
    %50 = arith.mulf %18, %49 : vector<32x256xf32>
    %cst_24 = arith.constant 1.000000e+00 : f32
    %51 = vector.broadcast %cst_24 : f32 to vector<32x256xf32>
    %52 = arith.addf %51, %50 : vector<32x256xf32>
    %53 = arith.mulf %11, %52 : vector<32x256xf32>
    %c0_25 = arith.constant 0 : index
    %c0_26 = arith.constant 0 : index
    %c0_27 = arith.constant 0 : index
    %54 = vector.load %arg6[%c0_25, %c0_26, %c0_27] : memref<1x32x256xf32, #tpu.memory_space<vmem>>, vector<1x32x256xf32>
    %55 = vector.shape_cast %54 : vector<1x32x256xf32> to vector<32x256xf32>
    %56 = vector.shape_cast %53 : vector<32x256xf32> to vector<1x32x256xf32>
    tpu.vector_store %arg6[%c0_25, %c0_26, %c0_27], %56 {strides = array<i32>} : memref<1x32x256xf32, #tpu.memory_space<vmem>>, vector<1x32x256xf32>,
    return
  }
  func.func @transform_0(%arg0: i32, %arg1: i32) -> (i32, i32, i32) {
    %c0_i32 = arith.constant 0 : i32
    %c0_i32_0 = arith.constant 0 : i32
    return %arg0, %c0_i32, %arg1 : i32, i32, i32
  }
  func.func @transform_1(%arg0: i32, %arg1: i32) -> (i32, i32, i32) {
    %c0_i32 = arith.constant 0 : i32
    %c0_i32_0 = arith.constant 0 : i32
    return %arg0, %c0_i32, %arg1 : i32, i32, i32
  }
  func.func @transform_2(%arg0: i32, %arg1: i32) -> (i32, i32) {
    %c0_i32 = arith.constant 0 : i32
    %c0_i32_0 = arith.constant 0 : i32
    %c0_i32_1 = arith.constant 0 : i32
    return %c0_i32, %c0_i32_0 : i32, i32
  }
  func.func @transform_3(%arg0: i32, %arg1: i32) -> (i32, i32) {
    %c0_i32 = arith.constant 0 : i32
    %c0_i32_0 = arith.constant 0 : i32
    %c0_i32_1 = arith.constant 0 : i32
    return %c0_i32, %c0_i32_0 : i32, i32
  }
  func.func @transform_4(%arg0: i32, %arg1: i32) -> (i32, i32, i32) {
    %c0_i32 = arith.constant 0 : i32
    %c0_i32_0 = arith.constant 0 : i32
    return %arg0, %c0_i32, %arg1 : i32, i32, i32
  }
}

module attributes {stable_mosaic.version = 11 : i64} {
  func.func @_last_layer_head_kernel(%arg0: i32, %arg1: i32, %arg2: memref<1x32x256xf32, #tpu.memory_space<vmem>>, %arg3: memref<1x32x256xf32, #tpu.memory_space<vmem>>, %arg4: memref<32x32xf32, #tpu.memory_space<vmem>>, %arg5: memref<32x1xf32, #tpu.memory_space<vmem>>, %arg6: memref<128x32xf32, #tpu.memory_space<vmem>>, %arg7: memref<128x1xf32, #tpu.memory_space<vmem>>, %arg8: memref<5x128xf32, #tpu.memory_space<vmem>>, %arg9: memref<5x1xf32, #tpu.memory_space<vmem>>, %arg10: memref<1x5x256xf32, #tpu.memory_space<vmem>>) attributes {dimension_semantics = [#tpu.dimension_semantics<parallel>, #tpu.dimension_semantics<parallel>], iteration_bounds = array<i64: 2, 1>, scalar_prefetch = 0 : i64, scratch_operands = 0 : i64, tpu.core_type = #tpu.core_type<tc>, window_params = [{transform_indices = @transform_0, window_bounds = array<i64: 1, 32, 256>}, {transform_indices = @transform_1, window_bounds = array<i64: 1, 32, 256>}, {pipeline_mode = #tpu.pipeline_mode<synchronous>, transform_indices = @transform_2, window_bounds = array<i64: 32, 32>}, {pipeline_mode = #tpu.pipeline_mode<synchronous>, transform_indices = @transform_3, window_bounds = array<i64: 32, 1>}, {pipeline_mode = #tpu.pipeline_mode<synchronous>, transform_indices = @transform_4, window_bounds = array<i64: 128, 32>}, {pipeline_mode = #tpu.pipeline_mode<synchronous>, transform_indices = @transform_5, window_bounds = array<i64: 128, 1>}, {pipeline_mode = #tpu.pipeline_mode<synchronous>, transform_indices = @transform_6, window_bounds = array<i64: 5, 128>}, {pipeline_mode = #tpu.pipeline_mode<synchronous>, transform_indices = @transform_7, window_bounds = array<i64: 5, 1>}, {transform_indices = @transform_8, window_bounds = array<i64: 1, 5, 256>}]} {
    %c0 = arith.constant 0 : index
    %c0_0 = arith.constant 0 : index
    %0 = vector.load %arg4[%c0, %c0_0] : memref<32x32xf32, #tpu.memory_space<vmem>>, vector<32x32xf32>
    %c0_1 = arith.constant 0 : index
    %c0_2 = arith.constant 0 : index
    %c0_3 = arith.constant 0 : index
    %1 = vector.load %arg2[%c0_1, %c0_2, %c0_3] : memref<1x32x256xf32, #tpu.memory_space<vmem>>, vector<1x32x256xf32>
    %2 = vector.shape_cast %1 : vector<1x32x256xf32> to vector<32x256xf32>
    %cst = arith.constant dense<0.000000e+00> : vector<32x256xf32>
    %3 = tpu.matmul %0, %2, %cst {dimension_numbers = #tpu.dot_dimension_numbers<[1], [0], [0], [1], [0, 0, 1, 1], [], []>} : vector<32x32xf32>, vector<32x256xf32>, vector<32x256xf32> -> vector<32x256xf32>
    %c0_4 = arith.constant 0 : index
    %c0_5 = arith.constant 0 : index
    %4 = vector.load %arg5[%c0_4, %c0_5] : memref<32x1xf32, #tpu.memory_space<vmem>>, vector<32x1xf32>
    %5 = vector.broadcast %4 : vector<32x1xf32> to vector<32x256xf32>
    %6 = arith.addf %3, %5 : vector<32x256xf32>
    %c0_6 = arith.constant 0 : index
    %c0_7 = arith.constant 0 : index
    %c0_8 = arith.constant 0 : index
    %7 = vector.load %arg3[%c0_6, %c0_7, %c0_8] : memref<1x32x256xf32, #tpu.memory_space<vmem>>, vector<1x32x256xf32>
    %8 = vector.shape_cast %7 : vector<1x32x256xf32> to vector<32x256xf32>
    %9 = arith.addf %6, %8 : vector<32x256xf32>
    %c0_9 = arith.constant 0 : index
    %c0_10 = arith.constant 0 : index
    %10 = vector.load %arg6[%c0_9, %c0_10] : memref<128x32xf32, #tpu.memory_space<vmem>>, vector<128x32xf32>
    %cst_11 = arith.constant dense<0.000000e+00> : vector<128x256xf32>
    %11 = tpu.matmul %10, %9, %cst_11 {dimension_numbers = #tpu.dot_dimension_numbers<[1], [0], [0], [1], [0, 0, 1, 1], [], []>} : vector<128x32xf32>, vector<32x256xf32>, vector<128x256xf32> -> vector<128x256xf32>
    %c0_12 = arith.constant 0 : index
    %c0_13 = arith.constant 0 : index
    %12 = vector.load %arg7[%c0_12, %c0_13] : memref<128x1xf32, #tpu.memory_space<vmem>>, vector<128x1xf32>
    %13 = vector.broadcast %12 : vector<128x1xf32> to vector<128x256xf32>
    %14 = arith.addf %11, %13 : vector<128x256xf32>
    %cst_14 = arith.constant 5.000000e-01 : f32
    %15 = vector.broadcast %cst_14 : f32 to vector<128x256xf32>
    %16 = arith.mulf %15, %14 : vector<128x256xf32>
    %cst_15 = arith.constant 0.707106769 : f32
    %17 = vector.broadcast %cst_15 : f32 to vector<128x256xf32>
    %18 = arith.mulf %14, %17 : vector<128x256xf32>
    %cst_16 = arith.constant 0.000000e+00 : f32
    %19 = vector.broadcast %cst_16 : f32 to vector<128x256xf32>
    %20 = arith.cmpf oge, %18, %19 : vector<128x256xf32>
    %cst_17 = arith.constant 1.000000e+00 : f32
    %cst_18 = arith.constant -1.000000e+00 : f32
    %21 = vector.broadcast %cst_17 : f32 to vector<128x256xf32>
    %22 = vector.broadcast %cst_18 : f32 to vector<128x256xf32>
    %23 = arith.select %20, %21, %22 : vector<128x256xi1>, vector<128x256xf32>
    %24 = math.absf %18 : vector<128x256xf32>
    %cst_19 = arith.constant 0.327591091 : f32
    %25 = vector.broadcast %cst_19 : f32 to vector<128x256xf32>
    %26 = arith.mulf %25, %24 : vector<128x256xf32>
    %cst_20 = arith.constant 1.000000e+00 : f32
    %27 = vector.broadcast %cst_20 : f32 to vector<128x256xf32>
    %28 = arith.addf %27, %26 : vector<128x256xf32>
    %29 = tpu.reciprocal %28 {approx = true} : vector<128x256xf32> -> vector<128x256xf32>
    %30 = arith.mulf %28, %29 : vector<128x256xf32>
    %cst_21 = arith.constant 2.000000e+00 : f32
    %31 = vector.broadcast %cst_21 : f32 to vector<128x256xf32>
    %32 = arith.subf %31, %30 : vector<128x256xf32>
    %33 = arith.mulf %29, %32 : vector<128x256xf32>
    %cst_22 = arith.constant 1.06140542 : f32
    %34 = vector.broadcast %cst_22 : f32 to vector<128x256xf32>
    %35 = arith.mulf %34, %33 : vector<128x256xf32>
    %cst_23 = arith.constant -1.45315206 : f32
    %36 = vector.broadcast %cst_23 : f32 to vector<128x256xf32>
    %37 = arith.addf %35, %36 : vector<128x256xf32>
    %38 = arith.mulf %37, %33 : vector<128x256xf32>
    %cst_24 = arith.constant 1.42141378 : f32
    %39 = vector.broadcast %cst_24 : f32 to vector<128x256xf32>
    %40 = arith.addf %38, %39 : vector<128x256xf32>
    %41 = arith.mulf %40, %33 : vector<128x256xf32>
    %cst_25 = arith.constant -0.284496725 : f32
    %42 = vector.broadcast %cst_25 : f32 to vector<128x256xf32>
    %43 = arith.addf %41, %42 : vector<128x256xf32>
    %44 = arith.mulf %43, %33 : vector<128x256xf32>
    %cst_26 = arith.constant 0.254829586 : f32
    %45 = vector.broadcast %cst_26 : f32 to vector<128x256xf32>
    %46 = arith.addf %44, %45 : vector<128x256xf32>
    %47 = arith.mulf %46, %33 : vector<128x256xf32>
    %cst_27 = arith.constant 0.000000e+00 : f32
    %48 = vector.broadcast %cst_27 : f32 to vector<128x256xf32>
    %49 = arith.subf %48, %24 : vector<128x256xf32>
    %50 = arith.mulf %49, %24 : vector<128x256xf32>
    %51 = math.exp %50 : vector<128x256xf32>
    %52 = arith.mulf %47, %51 : vector<128x256xf32>
    %cst_28 = arith.constant 1.000000e+00 : f32
    %53 = vector.broadcast %cst_28 : f32 to vector<128x256xf32>
    %54 = arith.subf %53, %52 : vector<128x256xf32>
    %55 = arith.mulf %23, %54 : vector<128x256xf32>
    %cst_29 = arith.constant 1.000000e+00 : f32
    %56 = vector.broadcast %cst_29 : f32 to vector<128x256xf32>
    %57 = arith.addf %56, %55 : vector<128x256xf32>
    %58 = arith.mulf %16, %57 : vector<128x256xf32>
    %c0_30 = arith.constant 0 : index
    %c0_31 = arith.constant 0 : index
    %59 = vector.load %arg8[%c0_30, %c0_31] : memref<5x128xf32, #tpu.memory_space<vmem>>, vector<5x128xf32>
    %cst_32 = arith.constant dense<0.000000e+00> : vector<5x256xf32>
    %60 = tpu.matmul %59, %58, %cst_32 {dimension_numbers = #tpu.dot_dimension_numbers<[1], [0], [0], [1], [0, 0, 1, 1], [], []>} : vector<5x128xf32>, vector<128x256xf32>, vector<5x256xf32> -> vector<5x256xf32>
    %c0_33 = arith.constant 0 : index
    %c0_34 = arith.constant 0 : index
    %61 = vector.load %arg9[%c0_33, %c0_34] : memref<5x1xf32, #tpu.memory_space<vmem>>, vector<5x1xf32>
    %62 = vector.broadcast %61 : vector<5x1xf32> to vector<5x256xf32>
    %63 = arith.addf %60, %62 : vector<5x256xf32>
    %c0_35 = arith.constant 0 : index
    %c0_36 = arith.constant 0 : index
    %c0_37 = arith.constant 0 : index
    %64 = vector.load %arg10[%c0_35, %c0_36, %c0_37] : memref<1x5x256xf32, #tpu.memory_space<vmem>>, vector<1x5x256xf32>
    %65 = vector.shape_cast %64 : vector<1x5x256xf32> to vector<5x256xf32>
    %66 = vector.shape_cast %63 : vector<5x256xf32> to vector<1x5x256xf32>
    tpu.vector_store %arg10[%c0_35, %c0_36, %c0_37], %66 {strides = array<i32>} : memref<1x5x256xf32, #tpu.memory_space<vmem>>, vector<1x5x256xf32>,
    return
  }
  func.func @transform_0(%arg0: i32, %arg1: i32) -> (i32, i32, i32) {
    %c0_i32 = arith.constant 0 : i32
    %c0_i32_0 = arith.constant 0 : i32
    return %arg0, %c0_i32, %arg1 : i32, i32, i32
  }
  func.func @transform_1(%arg0: i32, %arg1: i32) -> (i32, i32, i32) {
    %c0_i32 = arith.constant 0 : i32
    %c0_i32_0 = arith.constant 0 : i32
    return %arg0, %c0_i32, %arg1 : i32, i32, i32
  }
  func.func @transform_2(%arg0: i32, %arg1: i32) -> (i32, i32) {
    %c0_i32 = arith.constant 0 : i32
    %c0_i32_0 = arith.constant 0 : i32
    %c0_i32_1 = arith.constant 0 : i32
    return %c0_i32, %c0_i32_0 : i32, i32
  }
  func.func @transform_3(%arg0: i32, %arg1: i32) -> (i32, i32) {
    %c0_i32 = arith.constant 0 : i32
    %c0_i32_0 = arith.constant 0 : i32
    %c0_i32_1 = arith.constant 0 : i32
    return %c0_i32, %c0_i32_0 : i32, i32
  }
  func.func @transform_4(%arg0: i32, %arg1: i32) -> (i32, i32) {
    %c0_i32 = arith.constant 0 : i32
    %c0_i32_0 = arith.constant 0 : i32
    %c0_i32_1 = arith.constant 0 : i32
    return %c0_i32, %c0_i32_0 : i32, i32
  }
  func.func @transform_5(%arg0: i32, %arg1: i32) -> (i32, i32) {
    %c0_i32 = arith.constant 0 : i32
    %c0_i32_0 = arith.constant 0 : i32
    %c0_i32_1 = arith.constant 0 : i32
    return %c0_i32, %c0_i32_0 : i32, i32
  }
  func.func @transform_6(%arg0: i32, %arg1: i32) -> (i32, i32) {
    %c0_i32 = arith.constant 0 : i32
    %c0_i32_0 = arith.constant 0 : i32
    %c0_i32_1 = arith.constant 0 : i32
    return %c0_i32, %c0_i32_0 : i32, i32
  }
  func.func @transform_7(%arg0: i32, %arg1: i32) -> (i32, i32) {
    %c0_i32 = arith.constant 0 : i32
    %c0_i32_0 = arith.constant 0 : i32
    %c0_i32_1 = arith.constant 0 : i32
    return %c0_i32, %c0_i32_0 : i32, i32
  }
  func.func @transform_8(%arg0: i32, %arg1: i32) -> (i32, i32, i32) {
    %c0_i32 = arith.constant 0 : i32
    %c0_i32_0 = arith.constant 0 : i32
    return %arg0, %c0_i32, %arg1 : i32, i32, i32
  }
}

</mosaic_0001>

<bundles_post_ra>
// kernel: reverse.4
= control target key start
LH: loop header
LB: loop body
LE: loop exit
PB: predicated region body
PF: predicated region fallthrough
CT: control target
= control target key end

     0   :  { %s344_s0 = inlined_call_operand.vmem [shape: f32[2,32,16,7], index: 0, kind: input, shape index: {}]   ;;  %s345_s1 = inlined_call_operand.vmem [shape: f32[2,32,16,7], index: 1, kind: output, shape index: {}]  }
   0x1   :  { %v112_v0 = vld [vmem:[%s344_s0 + $0x60] sm:$0xff]  ;;  %v113_v1 = vld [vmem:[%s344_s0 + $0xd0] sm:$0xff]  ;;  %v138_v14 = vld [vmem:[%s344_s0 + $0x68] sm:$0xff] }
   0x2   :  { %v115_v2 = vld [vmem:[%s344_s0 + $0x50] sm:$0xff]  ;;  %4 = vst [vmem:[%s345_s1] sm:$0xff] %v112_v0  ;;  %114 = vst [vmem:[%s345_s1 + $0x70] sm:$0xff] %v113_v1  ;;  %v117_v3 = vld [vmem:[%s344_s0 + $0xc0] sm:$0xff] }
   0x3   :  { %116 = vst [vmem:[%s345_s1 + $0x10] sm:$0xff] %v115_v2  ;;  %v119_v4 = vld [vmem:[%s344_s0 + $0x40] sm:$0xff]  ;;  %v121_v5 = vld [vmem:[%s344_s0 + $0xb0] sm:$0xff]  ;;  %118 = vst [vmem:[%s345_s1 + $0x80] sm:$0xff] %v117_v3 }
   0x4   :  { %120 = vst [vmem:[%s345_s1 + $0x20] sm:$0xff] %v119_v4  ;;  %122 = vst [vmem:[%s345_s1 + $0x90] sm:$0xff] %v121_v5  ;;  %v123_v6 = vld [vmem:[%s344_s0 + $0x30] sm:$0xff]  ;;  %v125_v7 = vld [vmem:[%s344_s0 + $0xa0] sm:$0xff] }
   0x5   :  { %v127_v8 = vld [vmem:[%s344_s0 + $0x20] sm:$0xff]  ;;  %124 = vst [vmem:[%s345_s1 + $0x30] sm:$0xff] %v123_v6  ;;  %126 = vst [vmem:[%s345_s1 + $0xa0] sm:$0xff] %v125_v7  ;;  %v129_v9 = vld [vmem:[%s344_s0 + $0x90] sm:$0xff] }
   0x6   :  { %128 = vst [vmem:[%s345_s1 + $0x40] sm:$0xff] %v127_v8  ;;  %v131_v10 = vld [vmem:[%s344_s0 + $0x10] sm:$0xff]  ;;  %v133_v11 = vld [vmem:[%s344_s0 + $0x80] sm:$0xff]  ;;  %130 = vst [vmem:[%s345_s1 + $0xb0] sm:$0xff] %v129_v9 }
   0x7   :  { %132 = vst [vmem:[%s345_s1 + $0x50] sm:$0xff] %v131_v10  ;;  %134 = vst [vmem:[%s345_s1 + $0xc0] sm:$0xff] %v133_v11  ;;  %v49_v12 = vld [vmem:[%s344_s0] sm:$0xff]  ;;  %v136_v13 = vld [vmem:[%s344_s0 + $0x70] sm:$0xff] }
   0x8   :  { %135 = vst [vmem:[%s345_s1 + $0x60] sm:$0xff] %v49_v12  ;;  %137 = vst [vmem:[%s345_s1 + $0xd0] sm:$0xff] %v136_v13  ;;  %v140_v15 = vld [vmem:[%s344_s0 + $0xd8] sm:$0xff]  ;;  %v144_v17 = vld [vmem:[%s344_s0 + $0xc8] sm:$0xff] }
   0x9   :  { %139 = vst [vmem:[%s345_s1 + $0x8] sm:$0xff] %v138_v14  ;;  %v142_v16 = vld [vmem:[%s344_s0 + $0x58] sm:$0xff]  ;;  %141 = vst [vmem:[%s345_s1 + $0x78] sm:$0xff] %v140_v15  ;;  %v146_v18 = vld [vmem:[%s344_s0 + $0x48] sm:$0xff] }
   0xa   :  { %143 = vst [vmem:[%s345_s1 + $0x18] sm:$0xff] %v142_v16  ;;  %145 = vst [vmem:[%s345_s1 + $0x88] sm:$0xff] %v144_v17  ;;  %v148_v19 = vld [vmem:[%s344_s0 + $0xb8] sm:$0xff]  ;;  %v152_v21 = vld [vmem:[%s344_s0 + $0xa8] sm:$0xff] }
   0xb   :  { %v150_v20 = vld [vmem:[%s344_s0 + $0x38] sm:$0xff]  ;;  %147 = vst [vmem:[%s345_s1 + $0x28] sm:$0xff] %v146_v18  ;;  %149 = vst [vmem:[%s345_s1 + $0x98] sm:$0xff] %v148_v19  ;;  %v154_v22 = vld [vmem:[%s344_s0 + $0x28] sm:$0xff] }
   0xc   :  { %151 = vst [vmem:[%s345_s1 + $0x38] sm:$0xff] %v150_v20  ;;  %v156_v23 = vld [vmem:[%s344_s0 + $0x98] sm:$0xff]  ;;  %153 = vst [vmem:[%s345_s1 + $0xa8] sm:$0xff] %v152_v21  ;;  %v160_v25 = vld [vmem:[%s344_s0 + $0x88] sm:$0xff] }
   0xd   :  { %155 = vst [vmem:[%s345_s1 + $0x48] sm:$0xff] %v154_v22  ;;  %157 = vst [vmem:[%s345_s1 + $0xb8] sm:$0xff] %v156_v23  ;;  %v158_v24 = vld [vmem:[%s344_s0 + $0x18] sm:$0xff]  ;;  %v162_v26 = vld [vmem:[%s344_s0 + $0x8] sm:$0xff] }
   0xe   :  { %159 = vst [vmem:[%s345_s1 + $0x58] sm:$0xff] %v158_v24  ;;  %161 = vst [vmem:[%s345_s1 + $0xc8] sm:$0xff] %v160_v25  ;;  %v164_v27 = vld [vmem:[%s344_s0 + $0x78] sm:$0xff] }
   0xf   :  { %163 = vst [vmem:[%s345_s1 + $0x68] sm:$0xff] %v162_v26  ;;  %165 = vst [vmem:[%s345_s1 + $0xd8] sm:$0xff] %v164_v27 }

// kernel: state_de_forward.2
= control target key start
LH: loop header
LB: loop body
LE: loop exit
PB: predicated region body
PF: predicated region fallthrough
CT: control target
= control target key end

     0   :  { %s917_s15 = smov 0   ;;  %s919_s16 = smov 0   ;;  %s1141_s0 = inlined_call_operand.vmem [shape: f32[2,32,256], index: 0, kind: input, shape index: {}]   ;;  %s1142_s1 = inlined_call_operand.vmem [shape: f32[2,32,256], index: 1, kind: input, shape index: {}]   ;;  %s1143_s2 = inlined_call_operand.vmem [shape: f32[32,32], index: 2, kind: input, shape index: {}]   ;;  %s1144_s3 = inlined_call_operand.vmem [shape: f32[32,1], index: 3, kind: input, shape index: {}]   ;;  %s1145_s4 = inlined_call_operand.vmem [shape: f32[2,32,256], index: 4, kind: output, shape index: {}]  }
   0x1   :  { %s921_s17 = smov 0  }
   0x2 LB: > { %s26_s18 = sadd.s32 1, %s883_s16  ;;  %p776_p0 = scmp.ge.s32.totalorder %s887_s17, 1  ;;  %s887_s17 = sphi %s921_s17, %s14_s17   ;;  %s883_s16 = sphi %s919_s16, %s1147_s16   ;;  %s879_s15 = sphi %s917_s15, %s1146_s15  }
   0x3   : > { %p28_p1 = scmp.ge.s32.totalorder %s26_s18, 2  ;;  %p200_p2 = scmp.lt.s32.totalorder %s887_s17, 3 }
   0x5   : > { %s1149_s18 = smov (%p28_p1, %s26_s18), 0  ;;  %p201_p3 = pnand %p776_p0, %p200_p2 }
   0x6   : > { %p244_p4 = scmp.lt.s32.totalorder (!%p201_p3), %s879_s15, 1  ;;  %v889_v0 = vmov (!%p201_p3), 0.0   ;;  %v287_v1 = vld [vmem:[%s1144_s3 + $0x10] sm:$0xff] (!%p201_p3)  ;;  %v285_v2 = vld [vmem:[%s1144_s3] sm:$0xff] (!%p201_p3)  ;;  %v890_v3 = vmov (!%p201_p3), 0   ;;  %v288_v4 = vld [vmem:[%s1144_s3 + $0x18] sm:$0xff] (!%p201_p3) }
   0x7   : > { %204 = sbr.rel (%p201_p3) target bundleno = 320 (0x140), region = 36  ;;  %386 = vmatprep.mubr.f32.mxu0 (!%p201_p3), %v889_v0  ;;  %398 = vmatprep.mubr.f32.mxu1 (!%p201_p3), %v889_v0  ;;  %v286_v5 = vld [vmem:[%s1144_s3 + $0x8] sm:$0xff] (!%p201_p3)  ;;  %v273_v18 = vld [vmem:[%s1143_s2] sm:$0xff] (!%p201_p3)  ;;  %vm309_vm0 = vcmask (!%p201_p3), 261120   ;;  %v275_v19 = vld [vmem:[%s1143_s2 + $0x10] sm:$0xff] (!%p201_p3) }
   0x8   : > { %832 = vset.pattern.permute.xlu1 (!%p201_p3), %v890_v3  ;;  %831 = vset.pattern.permute.xlu0 (!%p201_p3), %v890_v3  ;;  %v274_v20 = vld [vmem:[%s1143_s2 + $0x8] sm:$0xff] (!%p201_p3)  ;;  %v276_v21 = vld [vmem:[%s1143_s2 + $0x18] sm:$0xff] (!%p201_p3) }
   0x9   : > { %301 = vperm.xlu1 (!%p201_p3), %832, %v287_v1   ;;  %291 = vperm.xlu0 (!%p201_p3), %831, %v285_v2  }
   0xd   : > { %306 = vperm.xlu1 (!%p201_p3), %832, %v288_v4   ;;  %296 = vperm.xlu0 (!%p201_p3), %831, %v286_v5  }
   0xe   : > { %s1151_s15 = smov (!%p244_p4, %s879_s15), 1 }
   0xf   : > { %s941_s23 = sshll.u32 %s1151_s15, 6 }
  0x10   : > { %s251_s30 = scalar_lea.vmem %s1141_s0, %s941_s23  ;;  %s969_s15 = scalar_lea.vmem %s1142_s1, %s941_s23 }
  0x11   : > { %v278_v6 = vld [vmem:[%s251_s30 + $0x8] sm:$0xff]  ;;  %v280_v7 = vld [vmem:[%s251_s30 + $0x18] sm:$0xff]  ;;  %v277_v8 = vld [vmem:[%s251_s30] sm:$0xff]  ;;  %s1092_s21 = scalar_lea.vmem %s1145_s4, %s941_s23 }
  0x12   : > { %v792_v9 = vpack.c.bf16 %v280_v7, %v278_v6  ;;  %v279_v10 = vld [vmem:[%s251_s30 + $0x10] sm:$0xff]  ;;  %v282_v11 = vld [vmem:[%s251_s30 + $0x28] sm:$0xff]  ;;  %v284_v12 = vld [vmem:[%s251_s30 + $0x38] sm:$0xff] }
  0x13   : > { %v794_v13 = vpack.c.bf16 %v279_v10, %v277_v8  ;;  %v796_v14 = vpack.c.bf16 %v284_v12, %v282_v11  ;;  %v281_v15 = vld [vmem:[%s251_s30 + $0x20] sm:$0xff]  ;;  %v283_v16 = vld [vmem:[%s251_s30 + $0x30] sm:$0xff]  ;;  %v412_v31 = vld [vmem:[%s969_s15 + $0x8] sm:$0xff] }
  0x14   : > { %793 = vmatprep.subr.bf16.mxu0 %v792_v9  ;;  %800 = vmatprep.subr.bf16.mxu1 %v792_v9  ;;  %v798_v17 = vpack.c.bf16 %v283_v16, %v281_v15  ;;  %v411_v25 = vld [vmem:[%s969_s15] sm:$0xff]  ;;  %v416_v33 = vld [vmem:[%s969_s15 + $0x28] sm:$0xff]  ;;  %v413_v58 = vld [vmem:[%s969_s15 + $0x10] sm:$0xff] }
  0x15   : > { %795 = vmatpush1.bf16.msra.mxu0 %v794_v13  ;;  %802 = vmatpush1.bf16.msra.mxu1 %v794_v13  ;;  %v415_v27 = vld [vmem:[%s969_s15 + $0x20] sm:$0xff]  ;;  %v417_v63 = vld [vmem:[%s969_s15 + $0x30] sm:$0xff]  ;;  %v414_v3 = vld [vmem:[%s969_s15 + $0x18] sm:$0xff] }
  0x16   : > { %797 = vmatprep.subr.bf16.mxu0 %v796_v14  ;;  %801 = vmatprep.subr.bf16.mxu1 %v796_v14  ;;  %v418_v4 = vld [vmem:[%s969_s15 + $0x38] sm:$0xff] }
  0x19   : > { %799 = vmatpush1.bf16.msra.mxu0 %v798_v17  ;;  %803 = vmatpush1.bf16.msra.mxu1 %v798_v17 }
  0x1c   : > { %783 = vmatmul.mubr.msk.f32.vlgmr.msra.gmra.mrb[0].mxu0 %vm309_vm0, %v273_v18  ;;  %785 = vmatmul.mubr.msk.f32.vlgmr.msra.gmra.mrb[0].mxu1 %vm309_vm0, %v275_v19 }
  0x1d   : > { %392 = vmatprep.mubr.f32.mxu0 %v889_v0  ;;  %404 = vmatprep.mubr.f32.mxu1 %v889_v0 }
  0x20   : > { %784 = vmatmul.mubr.msk.f32.gmra.mrb[2].mxu0 %vm309_vm0, %v274_v20  ;;  %786 = vmatmul.mubr.msk.f32.gmra.mrb[2].mxu1 %vm309_vm0, %v276_v21 }
  0x88   : > { %v302_v22 = vpop.permute.xlu1 %301  ;;  %v292_v23 = vpop.permute.xlu0 %291 }
  0x8c   : > { %v297_v56 = vpop.permute.xlu0 %296  ;;  %v307_v61 = vpop.permute.xlu1 %306 }
  0xef   : > { %v388_v24 = vpop.f32.mrb[0].mxu0  ;;  %v400_v26 = vpop.f32.mrb[0].mxu1 }
  0xf0   : > { %v389_v28 = vadd.f32 %v388_v24, %v292_v23  ;;  %v401_v29 = vadd.f32 %v400_v26, %v302_v22  ;;  %v390_v30 = vpop.f32.mrb[1].mxu0  ;;  %v402_v32 = vpop.f32.mrb[1].mxu1  ;;  %v891_v26 = vmov -1.0  }
  0xf1   : > { %v391_v34 = vadd.f32 %v390_v30, %v292_v23  ;;  %v403_v35 = vadd.f32 %v402_v32, %v302_v22 }
  0xf2   : > { %v419_v36 = vadd.f32 %v411_v25, %v389_v28  ;;  %v423_v37 = vadd.f32 %v415_v27, %v401_v29 }
  0xf3   : > { %v420_v38 = vadd.f32 %v412_v31, %v391_v34  ;;  %v424_v39 = vadd.f32 %v416_v33, %v403_v35  ;;  %v394_v40 = vpop.f32.mrb[2].mxu0  ;;  %v406_v41 = vpop.f32.mrb[2].mxu1 }
  0xf4   : > { %v435_v42 = vmul.f32 0.70710677, %v419_v36  ;;  %v439_v43 = vmul.f32 0.70710677, %v423_v37  ;;  %v396_v49 = vpop.f32.mrb[3].mxu0  ;;  %v408_v53 = vpop.f32.mrb[3].mxu1  ;;  %v395_v60 = vadd.f32 %v394_v40, %v297_v56  ;;  %v407_v1 = vadd.f32 %v406_v41, %v307_v61 }
  0xf5   : > { %v436_v44 = vmul.f32 0.70710677, %v420_v38  ;;  %v975_v48 = vmul.f32 0.70710677, %v424_v39  ;;  %v397_v2 = vadd.f32 %v396_v49, %v297_v56  ;;  %v409_v6 = vadd.f32 %v408_v53, %v307_v61 }
  0xf6   : > { %v459_v45 = vand.u32 2147483647, %v435_v42  ;;  %v463_v46 = vand.u32 2147483647, %v439_v43  ;;  %v983_v0 = vadd.f32 %v413_v58, %v395_v60  ;;  %v990_v9 = vadd.f32 %v417_v63, %v407_v1 }
  0xf7   : > { %v460_v47 = vand.u32 2147483647, %v436_v44  ;;  %v978_v57 = vand.u32 2147483647, %v975_v48  ;;  %v992_v11 = vadd.f32 %v414_v3, %v397_v2  ;;  %v994_v12 = vadd.f32 %v418_v4, %v409_v6 }
  0xf8   : > { %v467_v50 = vmul.f32 0.3275911, %v459_v45  ;;  %v471_v51 = vmul.f32 0.3275911, %v463_v46  ;;  %v587_v7 = vsub.f32 0.0, %v459_v45  ;;  %v591_v10 = vsub.f32 0.0, %v463_v46 }
  0xf9   : > { %v468_v52 = vmul.f32 0.3275911, %v460_v47  ;;  %v472_v62 = vmul.f32 0.3275911, %v978_v57  ;;  %v988_v8 = vmul.f32 0.70710677, %v983_v0 }
  0xfa   : > { %v475_v54 = vadd.f32 1.0, %v467_v50  ;;  %v479_v55 = vadd.f32 1.0, %v471_v51  ;;  %v996_v13 = vmul.f32 0.5, %v419_v36  ;;  %vm443_vm1 = vcmp.ge.f32.partialorder %v435_v42, 0.0 }
  0xfb   : > { %v476_v59 = vadd.f32 1.0, %v468_v52  ;;  %v480_v5 = vadd.f32 1.0, %v472_v62  ;;  %v461_v14 = vand.u32 2147483647, %v988_v8  ;;  %vm447_vm2 = vcmp.ge.f32.partialorder %v439_v43, 0.0 }
  0xfc   : > { %833 = vrcp.f32 %v475_v54  ;;  %vm444_vm3 = vcmp.ge.f32.partialorder %v436_v44, 0.0  ;;  %v588_v15 = vsub.f32 0.0, %v460_v47  ;;  %v1000_v16 = vmul.f32 0.70710677, %v990_v9 }
  0xfd   : > { %835 = vrcp.f32 %v479_v55  ;;  %v595_v17 = vmul.f32 %v587_v7, %v459_v45  ;;  %v1002_v18 = vmul.f32 0.5, %v423_v37  ;;  %v469_v19 = vmul.f32 0.3275911, %v461_v14 }
  0xfe   : > { %837 = vrcp.f32 %v476_v59  ;;  %v1005_v20 = vmul.f32 0.70710677, %v992_v11  ;;  %v599_v21 = vmul.f32 %v591_v10, %v463_v46  ;;  %v1007_v22 = vmul.f32 0.5, %v420_v38 }
  0xff   : > { %839 = vrcp.f32 %v480_v5  ;;  %v1009_v23 = vmul.f32 0.5, %v424_v39  ;;  %v465_v24 = vand.u32 2147483647, %v1000_v16  ;;  %v1014_v27 = vsel %vm443_vm1, 1.0, %v891_v26 }
 0x100   : > { %v1017_v28 = vsel %vm447_vm2, 1.0, %v891_v26  ;;  %v1020_v29 = vsel %vm444_vm3, 1.0, %v891_v26  ;;  %v477_v30 = vadd.f32 1.0, %v469_v19  ;;  %v596_v33 = vmul.f32 %v588_v15, %v460_v47 }
 0x101   : > { %vm448_vm4 = vcmp.ge.f32.partialorder %v975_v48, 0.0  ;;  %v473_v34 = vmul.f32 0.3275911, %v465_v24  ;;  %v603_v35 = vmul.f32 1.442695, %v595_v17  ;;  %v592_v40 = vsub.f32 0.0, %v978_v57 }
 0x102   : > { %841 = vrcp.f32 %v477_v30  ;;  %v462_v37 = vand.u32 2147483647, %v1005_v20  ;;  %v611_v39 = vmul.f32 1.442695, %v599_v21  ;;  %v1026_v44 = vsel %vm448_vm4, 1.0, %v891_v26 }
 0x103   : > { %v481_v41 = vadd.f32 1.0, %v473_v34  ;;  %v1029_v46 = vmul.f32 0.70710677, %v994_v12  ;;  %v605_v49 = vmul.f32 1.442695, %v596_v33  ;;  %v589_v52 = vsub.f32 0.0, %v461_v14 }
 0x104   : > { %v470_v45 = vmul.f32 0.3275911, %v462_v37  ;;  %v600_v58 = vmul.f32 %v592_v40, %v978_v57  ;;  %v593_v61 = vsub.f32 0.0, %v465_v24  ;;  %v590_v4 = vsub.f32 0.0, %v462_v37 }
 0x105   : > { %843 = vrcp.f32 %v481_v41  ;;  %v597_v3 = vmul.f32 %v589_v52, %v461_v14  ;;  %vm445_vm5 = vcmp.ge.f32.partialorder %v988_v8, 0.0  ;;  %vm449_vm6 = vcmp.ge.f32.partialorder %v1000_v16, 0.0 }
 0x106   : > { %v834_v25 = vpop.eup %833  ;;  %845 = vpow2.f32 %v603_v35  ;;  %v478_v53 = vadd.f32 1.0, %v470_v45  ;;  %v613_v17 = vmul.f32 1.442695, %v600_v58  ;;  %v601_v19 = vmul.f32 %v593_v61, %v465_v24 }
 0x107   : > { %v836_v31 = vpop.eup %835  ;;  %v491_v32 = vmul.f32 %v834_v25, %v475_v54  ;;  %v607_v34 = vmul.f32 1.442695, %v597_v3  ;;  %v598_v35 = vmul.f32 %v590_v4, %v462_v37  ;;  %vm446_vm7 = vcmp.ge.f32.partialorder %v1005_v20, 0.0 }
 0x108   : > { %v495_v36 = vmul.f32 %v836_v31, %v479_v55  ;;  %v838_v42 = vpop.eup %837  ;;  %847 = vrcp.f32 %v478_v53  ;;  %v430_v20 = vmul.f32 0.5, %v992_v11  ;;  %vm450_vm8 = vcmp.ge.f32.partialorder %v1029_v46, 0.0 }
 0x109   : > { %v499_v38 = vsub.f32 2.0, %v491_v32  ;;  %v492_v48 = vmul.f32 %v838_v42, %v476_v59  ;;  %v840_v50 = vpop.eup %839  ;;  %v1039_v59 = vand.u32 2147483647, %v1029_v46  ;;  %849 = vpow2.f32 %v611_v39 }
 0x10a   : > { %v503_v43 = vsub.f32 2.0, %v495_v36  ;;  %v496_v56 = vmul.f32 %v840_v50, %v480_v5  ;;  %851 = vpow2.f32 %v605_v49 }
 0x10b   : > { %v1031_v47 = vmul.f32 %v834_v25, %v499_v38  ;;  %v500_v55 = vsub.f32 2.0, %v492_v48  ;;  %v474_v6 = vmul.f32 0.3275911, %v1039_v59  ;;  %v615_v48 = vmul.f32 1.442695, %v601_v19 }
 0x10c   : > { %v1033_v51 = vmul.f32 %v836_v31, %v503_v43  ;;  %v504_v1 = vsub.f32 2.0, %v496_v56  ;;  %v842_v10 = vpop.eup %841  ;;  %v609_v56 = vmul.f32 1.442695, %v598_v35 }
 0x10d   : > { %v515_v54 = vmul.f32 1.0614054, %v1031_v47  ;;  %v1041_v63 = vmul.f32 %v838_v42, %v500_v55  ;;  %v1049_v21 = vadd.f32 1.0, %v474_v6  ;;  %v493_v32 = vmul.f32 %v842_v10, %v477_v30 }
 0x10e   : > { %v519_v60 = vmul.f32 1.0614054, %v1033_v51  ;;  %v1046_v7 = vmul.f32 %v840_v50, %v504_v1 }
 0x10f   : > { %v523_v62 = vadd.f32 -1.4531521, %v515_v54  ;;  %v516_v57 = vmul.f32 1.0614054, %v1041_v63  ;;  %853 = vrcp.f32 %v1049_v21  ;;  %v844_v36 = vpop.eup %843  ;;  %v501_v42 = vsub.f32 2.0, %v493_v32 }
 0x110   : > { %v527_v2 = vadd.f32 -1.4531521, %v519_v60  ;;  %v520_v14 = vmul.f32 1.0614054, %v1046_v7  ;;  %v846_v24 = vpop.eup %845  ;;  %855 = vpow2.f32 %v613_v17  ;;  %v497_v45 = vmul.f32 %v844_v36, %v481_v41 }
 0x111   : > { %v531_v5 = vmul.f32 %v523_v62, %v1031_v47  ;;  %v524_v31 = vadd.f32 -1.4531521, %v516_v57  ;;  %v1057_v37 = vmul.f32 %v842_v10, %v501_v42  ;;  %857 = vpow2.f32 %v607_v34 }
 0x112   : > { %v535_v15 = vmul.f32 %v527_v2, %v1033_v51  ;;  %v528_v40 = vadd.f32 -1.4531521, %v520_v14  ;;  %v848_v52 = vpop.eup %847  ;;  %v505_v55 = vsub.f32 2.0, %v497_v45  ;;  %859 = vpow2.f32 %v615_v48 }
 0x113   : > { %v539_v25 = vadd.f32 1.4214138, %v531_v5  ;;  %v532_v39 = vmul.f32 %v524_v31, %v1041_v63  ;;  %v850_v58 = vpop.eup %849  ;;  %v517_v41 = vmul.f32 1.0614054, %v1057_v37  ;;  %v494_v3 = vmul.f32 %v848_v52, %v478_v53 }
 0x114   : > { %v543_v33 = vadd.f32 1.4214138, %v535_v15  ;;  %v536_v50 = vmul.f32 %v528_v40, %v1046_v7  ;;  %v1063_v2 = vmul.f32 %v844_v36, %v505_v55  ;;  %v852_v4 = vpop.eup %851  ;;  %861 = vpow2.f32 %v609_v56 }
 0x115   : > { %v547_v38 = vmul.f32 %v539_v25, %v1031_v47  ;;  %v540_v30 = vadd.f32 1.4214138, %v532_v39  ;;  %v525_v10 = vadd.f32 -1.4531521, %v517_v41  ;;  %v502_v19 = vsub.f32 2.0, %v494_v3 }
 0x116   : > { %v551_v43 = vmul.f32 %v543_v33, %v1033_v51  ;;  %v544_v62 = vadd.f32 1.4214138, %v536_v50  ;;  %v521_v17 = vmul.f32 1.0614054, %v1063_v2  ;;  %v594_v36 = vsub.f32 0.0, %v1039_v59 }
 0x117   : > { %v555_v49 = vadd.f32 -0.28449672, %v547_v38  ;;  %v548_v61 = vmul.f32 %v540_v30, %v1041_v63  ;;  %v533_v32 = vmul.f32 %v525_v10, %v1057_v37  ;;  %v1071_v35 = vmul.f32 %v848_v52, %v502_v19 }
 0x118   : > { %v559_v54 = vadd.f32 -0.28449672, %v551_v43  ;;  %v552_v57 = vmul.f32 %v544_v62, %v1046_v7  ;;  %v529_v34 = vadd.f32 -1.4531521, %v521_v17 }
 0x119   : > { %v563_v60 = vmul.f32 %v555_v49, %v1031_v47  ;;  %v556_v5 = vadd.f32 -0.28449672, %v548_v61  ;;  %v854_v33 = vpop.eup %853  ;;  %v541_v42 = vadd.f32 1.4214138, %v533_v32  ;;  %v518_v48 = vmul.f32 1.0614054, %v1071_v35 }
 0x11a   : > { %v567_v1 = vmul.f32 %v559_v54, %v1033_v51  ;;  %v560_v14 = vadd.f32 -0.28449672, %v552_v57  ;;  %v856_v43 = vpop.eup %855  ;;  %v537_v45 = vmul.f32 %v529_v34, %v1063_v2  ;;  %v498_v49 = vmul.f32 %v854_v33, %v1049_v21 }
 0x11b   : > { %v571_v6 = vadd.f32 0.2548296, %v563_v60  ;;  %v564_v31 = vmul.f32 %v556_v5, %v1041_v63  ;;  %v549_v52 = vmul.f32 %v541_v42, %v1057_v37  ;;  %v858_v54 = vpop.eup %857  ;;  %v526_v56 = vadd.f32 -1.4531521, %v518_v48 }
 0x11c   : > { %v575_v15 = vadd.f32 0.2548296, %v567_v1  ;;  %v568_v40 = vmul.f32 %v560_v14, %v1046_v7  ;;  %v545_v55 = vadd.f32 1.4214138, %v537_v45  ;;  %v506_v60 = vsub.f32 2.0, %v498_v49  ;;  %v860_v1 = vpop.eup %859 }
 0x11d   : > { %v579_v25 = vmul.f32 %v571_v6, %v1031_v47  ;;  %v572_v39 = vadd.f32 0.2548296, %v564_v31  ;;  %v557_v41 = vadd.f32 -0.28449672, %v549_v52  ;;  %v534_v3 = vmul.f32 %v526_v56, %v1071_v35 }
 0x11e   : > { %v583_v53 = vmul.f32 %v575_v15, %v1033_v51  ;;  %v576_v50 = vadd.f32 0.2548296, %v568_v40  ;;  %v1085_v6 = vmul.f32 %v854_v33, %v506_v60  ;;  %v862_v17 = vpop.eup %861 }
 0x11f   : > { %v619_v38 = vmul.f32 %v846_v24, %v579_v25  ;;  %v580_v51 = vmul.f32 %v572_v39, %v1041_v63  ;;  %v553_v63 = vmul.f32 %v545_v55, %v1063_v2  ;;  %v565_v15 = vmul.f32 %v557_v41, %v1057_v37 }
 0x120   : > { %v623_v47 = vmul.f32 %v850_v58, %v583_v53  ;;  %v584_v62 = vmul.f32 %v576_v50, %v1046_v7  ;;  %v542_v7 = vadd.f32 1.4214138, %v534_v3  ;;  %v522_v34 = vmul.f32 1.0614054, %v1085_v6 }
 0x121   : > { %v627_v30 = vsub.f32 1.0, %v619_v38  ;;  %v620_v61 = vmul.f32 %v852_v4, %v580_v51  ;;  %v602_v4 = vmul.f32 %v594_v36, %v1039_v59  ;;  %v573_v14 = vadd.f32 0.2548296, %v565_v15 }
 0x122   : > { %v631_v24 = vsub.f32 1.0, %v623_v47  ;;  %v624_v10 = vmul.f32 %v856_v43, %v584_v62  ;;  %v550_v53 = vmul.f32 %v542_v7, %v1071_v35  ;;  %v530_v36 = vadd.f32 -1.4531521, %v522_v34 }
 0x123   : > { %v635_v58 = vmul.f32 %v627_v30, %v1014_v27  ;;  %v628_v57 = vsub.f32 1.0, %v620_v61  ;;  %v617_v43 = vmul.f32 1.442695, %v602_v4  ;;  %v458_v15 = vsel %vm450_vm8, 1.0, %v891_v26 }
 0x124   : > { %v639_v21 = vmul.f32 %v631_v24, %v1017_v28  ;;  %v561_v28 = vadd.f32 -0.28449672, %v553_v63  ;;  %v632_v31 = vsub.f32 1.0, %v624_v10  ;;  %v558_v59 = vadd.f32 -0.28449672, %v550_v53 }
 0x125   : > { %v643_v5 = vadd.f32 1.0, %v635_v58  ;;  %v636_v25 = vmul.f32 %v628_v57, %v1020_v29  ;;  %863 = vpow2.f32 %v617_v43  ;;  %v457_v24 = vsel %vm449_vm6, 1.0, %v891_v26 }
 0x126   : > { %v647_v27 = vadd.f32 1.0, %v639_v21  ;;  %v569_v33 = vmul.f32 %v561_v28, %v1063_v2  ;;  %v640_v39 = vmul.f32 %v632_v31, %v1026_v44  ;;  %v566_v45 = vmul.f32 %v558_v59, %v1071_v35 }
 0x127   : > { %v651_v19 = vmul.f32 %v643_v5, %v996_v13  ;;  %v644_v38 = vadd.f32 1.0, %v636_v25  ;;  %v581_v13 = vmul.f32 %v573_v14, %v1057_v37  ;;  %v538_v44 = vmul.f32 %v530_v36, %v1085_v6 }
 0x128   : > { %v655_v32 = vmul.f32 %v647_v27, %v1002_v18  ;;  %v577_v29 = vadd.f32 0.2548296, %v569_v33  ;;  %v648_v40 = vadd.f32 1.0, %v640_v39  ;;  %v453_v37 = vsel %vm445_vm5, 1.0, %v891_v26 }
 0x129   : > { %659 = vst [vmem:[%s1092_s21] sm:$0xff] %v651_v19  ;;  %v652_v18 = vmul.f32 %v644_v38, %v1007_v22  ;;  %v621_v42 = vmul.f32 %v858_v54, %v581_v13  ;;  %v574_v30 = vadd.f32 0.2548296, %v566_v45  ;;  %v546_v22 = vadd.f32 1.4214138, %v538_v44 }
 0x12a   : > { %663 = vst [vmem:[%s1092_s21 + $0x20] sm:$0xff] %v655_v32  ;;  %v585_v47 = vmul.f32 %v577_v29, %v1063_v2  ;;  %v656_v8 = vmul.f32 %v648_v40, %v1009_v23  ;;  %v429_v54 = vmul.f32 0.5, %v983_v0  ;;  %v433_v58 = vmul.f32 0.5, %v990_v9 }
 0x12b   : > { %660 = vst [vmem:[%s1092_s21 + $0x8] sm:$0xff] %v652_v18  ;;  %v629_v48 = vsub.f32 1.0, %v621_v42  ;;  %v582_v50 = vmul.f32 %v574_v30, %v1071_v35  ;;  %v554_v52 = vmul.f32 %v546_v22, %v1085_v6  ;;  %v454_v0 = vsel %vm446_vm7, 1.0, %v891_v26 }
 0x12c   : > { %v625_v49 = vmul.f32 %v860_v1, %v585_v47  ;;  %664 = vst [vmem:[%s1092_s21 + $0x28] sm:$0xff] %v656_v8  ;;  %v434_v27 = vmul.f32 0.5, %v994_v12 }
 0x12d   : > { %v637_v51 = vmul.f32 %v629_v48, %v453_v37  ;;  %v622_v16 = vmul.f32 %v862_v17, %v582_v50  ;;  %v562_v56 = vadd.f32 -0.28449672, %v554_v52 }
 0x12e   : > { %v633_v2 = vsub.f32 1.0, %v625_v49 }
 0x12f   : > { %v645_v23 = vadd.f32 1.0, %v637_v51  ;;  %v630_v62 = vsub.f32 1.0, %v622_v16  ;;  %v570_v35 = vmul.f32 %v562_v56, %v1085_v6  ;;  %v864_v5 = vpop.eup %863 }
 0x130   : > { %v641_v55 = vmul.f32 %v633_v2, %v457_v24 }
 0x131   : > { %v653_v60 = vmul.f32 %v645_v23, %v429_v54  ;;  %v638_v1 = vmul.f32 %v630_v62, %v454_v0  ;;  %v578_v21 = vadd.f32 0.2548296, %v570_v35 }
 0x132   : > { %v649_v61 = vadd.f32 1.0, %v641_v55 }
 0x133   : > { %661 = vst [vmem:[%s1092_s21 + $0x10] sm:$0xff] %v653_v60  ;;  %v646_v63 = vadd.f32 1.0, %v638_v1  ;;  %v586_v3 = vmul.f32 %v578_v21, %v1085_v6 }
 0x134   : > { %v657_v41 = vmul.f32 %v649_v61, %v433_v58 }
 0x135   : > { %v654_v9 = vmul.f32 %v646_v63, %v430_v20  ;;  %v626_v57 = vmul.f32 %v864_v5, %v586_v3 }
 0x136   : > { %665 = vst [vmem:[%s1092_s21 + $0x30] sm:$0xff] %v657_v41 }
 0x137   : > { %662 = vst [vmem:[%s1092_s21 + $0x18] sm:$0xff] %v654_v9  ;;  %v634_v10 = vsub.f32 1.0, %v626_v57 }
 0x139   : > { %v642_v17 = vmul.f32 %v634_v10, %v458_v15 }
 0x13b   : > { %v650_v28 = vadd.f32 1.0, %v642_v17 }
 0x13d   : > { %v658_v7 = vmul.f32 %v650_v28, %v434_v27 }
 0x13f   : > { %666 = vst [vmem:[%s1092_s21 + $0x38] sm:$0xff] %v658_v7 }
 0x140 PF: > { %s14_s17 = sadd.s32 1, %s887_s17   ;;  %s1146_s15 = smov %s883_s16 }
 0x141   : > { %p11_p5 = scmp.ge.s32.totalorder %s14_s17, 4   ;;  %s1147_s16 = smov %s1149_s18 }
 0x143   :  { %13 = sbr.rel (!%p11_p5) target bundleno = 2 (0x2), region = 69 }

// kernel: state_de_forward.3
= control target key start
LH: loop header
LB: loop body
LE: loop exit
PB: predicated region body
PF: predicated region fallthrough
CT: control target
= control target key end

     0   :  { %s2282_s27 = smov 0   ;;  %s2284_s28 = smov 0   ;;  %s3515_s0 = inlined_call_operand.vmem [shape: f32[2,32,256], index: 0, kind: input, shape index: {}]   ;;  %s3516_s1 = inlined_call_operand.vmem [shape: f32[2,32,256], index: 1, kind: input, shape index: {}]   ;;  %s3517_s2 = inlined_call_operand.vmem [shape: f32[32,32], index: 2, kind: input, shape index: {}]   ;;  %s3518_s3 = inlined_call_operand.vmem [shape: f32[32,1], index: 3, kind: input, shape index: {}]   ;;  %s3519_s4 = inlined_call_operand.vmem [shape: f32[128,32], index: 4, kind: input, shape index: {}]   ;;  %s3520_s5 = inlined_call_operand.vmem [shape: f32[128,1], index: 5, kind: input, shape index: {}]   ;;  %s3521_s6 = inlined_call_operand.vmem [shape: f32[5,128], index: 6, kind: input, shape index: {}]   ;;  %s3522_s7 = inlined_call_operand.vmem [shape: f32[5,1], index: 7, kind: input, shape index: {}]   ;;  %s3523_s8 = inlined_call_operand.vmem [shape: f32[2,5,256], index: 8, kind: output, shape index: {}]  }
   0x1   :  { %s2286_s29 = smov 0  }
   0x2 LB: > { %s30_s30 = sadd.s32 1, %s2228_s28  ;;  %p1973_p0 = scmp.ge.s32.totalorder %s2232_s29, 1  ;;  %s2232_s29 = sphi %s2286_s29, %s18_s29   ;;  %s2228_s28 = sphi %s2284_s28, %s3583_s28   ;;  %s2224_s27 = sphi %s2282_s27, %s3582_s27  }
   0x3   : > { %p32_p1 = scmp.ge.s32.totalorder %s30_s30, 2  ;;  %p300_p2 = scmp.lt.s32.totalorder %s2232_s29, 3 }
   0x5   : > { %s3585_s30 = smov (%p32_p1, %s30_s30), 0  ;;  %p301_p3 = pnand %p1973_p0, %p300_p2 }
   0x7   : > { %304 = sbr.rel (%p301_p3) target bundleno = 966 (0x3c6), region = 52 }
   0xe   : > { %p352_p4 = scmp.lt.s32.totalorder %s2224_s27, 1  ;;  %v2234_v0 = vmov 0.0   ;;  %v393_v1 = vld [vmem:[%s3518_s3] sm:$0xff]  ;;  %v2235_v2 = vmov 0   ;;  %v395_v3 = vld [vmem:[%s3518_s3 + $0x10] sm:$0xff]  ;;  %v394_v4 = vld [vmem:[%s3518_s3 + $0x8] sm:$0xff] }
   0xf   : > { %494 = vmatprep.mubr.f32.mxu0 %v2234_v0  ;;  %759 = vmatprep.mubr.f32.mxu1 %v2234_v0  ;;  %v396_v5 = vld [vmem:[%s3518_s3 + $0x18] sm:$0xff]  ;;  %v551_v17 = vld [vmem:[%s3520_s5] sm:$0xff]  ;;  %v552_v18 = vld [vmem:[%s3520_s5 + $0x8] sm:$0xff]  ;;  %vm417_vm0 = vcmask 261120  }
  0x10   : > { %s3587_s27 = smov (!%p352_p4, %s2224_s27), 1  ;;  %2080 = vset.pattern.permute.xlu0 %v2235_v2  ;;  %2081 = vset.pattern.permute.xlu1 %v2235_v2  ;;  %v553_v20 = vld [vmem:[%s3520_s5 + $0x10] sm:$0xff]  ;;  %v554_v21 = vld [vmem:[%s3520_s5 + $0x18] sm:$0xff]  ;;  %v381_v22 = vld [vmem:[%s3517_s2] sm:$0xff] }
  0x11   : > { %399 = vperm.xlu0 %2080, %v393_v1   ;;  %409 = vperm.xlu1 %2081, %v395_v3   ;;  %s2002_s13 = sshll.u32 %s3587_s27, 6  ;;  %v555_v23 = vld [vmem:[%s3520_s5 + $0x20] sm:$0xff]  ;;  %v556_v24 = vld [vmem:[%s3520_s5 + $0x28] sm:$0xff]  ;;  %v557_v26 = vld [vmem:[%s3520_s5 + $0x30] sm:$0xff]  ;;  %s2004_s12 = sshll.u32 %s3587_s27, 4 }
  0x12   : > { %s359_s20 = scalar_lea.vmem %s3515_s0, %s2002_s13  ;;  %v382_v25 = vld [vmem:[%s3517_s2 + $0x8] sm:$0xff]  ;;  %v558_v27 = vld [vmem:[%s3520_s5 + $0x38] sm:$0xff]  ;;  %v383_v28 = vld [vmem:[%s3517_s2 + $0x10] sm:$0xff]  ;;  %s2398_s14 = scalar_lea.vmem %s3516_s1, %s2002_s13 }
  0x13   : > { %v386_v6 = vld [vmem:[%s359_s20 + $0x8] sm:$0xff]  ;;  %v388_v7 = vld [vmem:[%s359_s20 + $0x18] sm:$0xff]  ;;  %v385_v8 = vld [vmem:[%s359_s20] sm:$0xff]  ;;  %s379_s15 = scalar_lea.vmem %s3523_s8, %s2004_s12 }
  0x14   : > { %v2005_v9 = vpack.c.bf16 %v388_v7, %v386_v6  ;;  %v387_v10 = vld [vmem:[%s359_s20 + $0x10] sm:$0xff]  ;;  %v390_v11 = vld [vmem:[%s359_s20 + $0x28] sm:$0xff]  ;;  %v392_v12 = vld [vmem:[%s359_s20 + $0x38] sm:$0xff] }
  0x15   : > { %404 = vperm.xlu0 %2080, %v394_v4   ;;  %414 = vperm.xlu1 %2081, %v396_v5   ;;  %v2007_v13 = vpack.c.bf16 %v387_v10, %v385_v8  ;;  %v2009_v14 = vpack.c.bf16 %v392_v12, %v390_v11  ;;  %v389_v15 = vld [vmem:[%s359_s20 + $0x20] sm:$0xff]  ;;  %v391_v16 = vld [vmem:[%s359_s20 + $0x30] sm:$0xff]  ;;  %v560_v30 = vld [vmem:[%s3520_s5 + $0x48] sm:$0xff] }
  0x16   : > { %2006 = vmatprep.subr.bf16.mxu0 %v2005_v9  ;;  %v2011_v19 = vpack.c.bf16 %v391_v16, %v389_v15  ;;  %v559_v29 = vld [vmem:[%s3520_s5 + $0x40] sm:$0xff]  ;;  %v384_v31 = vld [vmem:[%s3517_s2 + $0x18] sm:$0xff]  ;;  %v561_v32 = vld [vmem:[%s3520_s5 + $0x50] sm:$0xff] }
  0x17   : > { %2008 = vmatpush1.bf16.msra.mxu0 %v2007_v13  ;;  %v562_v33 = vld [vmem:[%s3520_s5 + $0x58] sm:$0xff]  ;;  %v563_v34 = vld [vmem:[%s3520_s5 + $0x60] sm:$0xff]  ;;  %v564_v35 = vld [vmem:[%s3520_s5 + $0x68] sm:$0xff] }
  0x18   : > { %2010 = vmatprep.subr.bf16.mxu0 %v2009_v14  ;;  %v565_v36 = vld [vmem:[%s3520_s5 + $0x70] sm:$0xff]  ;;  %v566_v37 = vld [vmem:[%s3520_s5 + $0x78] sm:$0xff]  ;;  %v1785_v38 = vld [vmem:[%s3522_s7] sm:$0x1f] }
  0x19   : > { %569 = vperm.xlu0 %2080, %v551_v17   ;;  %574 = vperm.xlu1 %2081, %v552_v18   ;;  %v519_v41 = vld [vmem:[%s2398_s14] sm:$0xff]  ;;  %v520_v44 = vld [vmem:[%s2398_s14 + $0x8] sm:$0xff]  ;;  %v521_v49 = vld [vmem:[%s2398_s14 + $0x10] sm:$0xff] }
  0x1a   : > { %v522_v53 = vld [vmem:[%s2398_s14 + $0x18] sm:$0xff]  ;;  %v523_v58 = vld [vmem:[%s2398_s14 + $0x20] sm:$0xff]  ;;  %v524_v62 = vld [vmem:[%s2398_s14 + $0x28] sm:$0xff] }
  0x1b   : > { %2012 = vmatpush1.bf16.msra.mxu0 %v2011_v19  ;;  %v525_v7 = vld [vmem:[%s2398_s14 + $0x30] sm:$0xff]  ;;  %v526_v10 = vld [vmem:[%s2398_s14 + $0x38] sm:$0xff]  ;;  %v535_v16 = vld [vmem:[%s3519_s4] sm:$0xff] }
  0x1c   : > { %v536_v17 = vld [vmem:[%s3519_s4 + $0x8] sm:$0xff]  ;;  %v537_v18 = vld [vmem:[%s3519_s4 + $0x10] sm:$0xff]  ;;  %v538_v19 = vld [vmem:[%s3519_s4 + $0x18] sm:$0xff] }
  0x1d   : > { %579 = vperm.xlu0 %2080, %v553_v20   ;;  %584 = vperm.xlu1 %2081, %v554_v21   ;;  %v539_v20 = vld [vmem:[%s3519_s4 + $0x20] sm:$0xff]  ;;  %v540_v21 = vld [vmem:[%s3519_s4 + $0x28] sm:$0xff] }
  0x1e   : > { %1980 = vmatmul.mubr.msk.f32.vlgmr.msra.gmra.mrb[0].mxu0 %vm417_vm0, %v381_v22  ;;  %v541_v22 = vld [vmem:[%s3519_s4 + $0x30] sm:$0xff] }
  0x1f   : > { %500 = vmatprep.mubr.f32.mxu0 %v2234_v0 }
  0x21   : > { %589 = vperm.xlu0 %2080, %v555_v23   ;;  %594 = vperm.xlu1 %2081, %v556_v24   ;;  %v542_v23 = vld [vmem:[%s3519_s4 + $0x38] sm:$0xff]  ;;  %v543_v24 = vld [vmem:[%s3519_s4 + $0x40] sm:$0xff] }
  0x22   : > { %1981 = vmatmul.mubr.msk.f32.gmra.mrb[2].mxu0 %vm417_vm0, %v382_v25  ;;  %v544_v25 = vld [vmem:[%s3519_s4 + $0x48] sm:$0xff] }
  0x23   : > { %506 = vmatprep.mubr.f32.mxu0 %v2234_v0 }
  0x25   : > { %599 = vperm.xlu0 %2080, %v557_v26   ;;  %604 = vperm.xlu1 %2081, %v558_v27   ;;  %v545_v26 = vld [vmem:[%s3519_s4 + $0x50] sm:$0xff]  ;;  %v546_v27 = vld [vmem:[%s3519_s4 + $0x58] sm:$0xff] }
  0x26   : > { %1982 = vmatmul.mubr.msk.f32.gmra.mrb[4].mxu0 %vm417_vm0, %v383_v28  ;;  %v547_v28 = vld [vmem:[%s3519_s4 + $0x60] sm:$0xff] }
  0x27   : > { %512 = vmatprep.mubr.f32.mxu0 %v2234_v0 }
  0x29   : > { %609 = vperm.xlu0 %2080, %v559_v29   ;;  %614 = vperm.xlu1 %2081, %v560_v30   ;;  %v548_v29 = vld [vmem:[%s3519_s4 + $0x68] sm:$0xff]  ;;  %v549_v30 = vld [vmem:[%s3519_s4 + $0x70] sm:$0xff] }
  0x2a   : > { %1983 = vmatmul.mubr.msk.f32.gmra.mrb[6].mxu0 %vm417_vm0, %v384_v31  ;;  %v550_v31 = vld [vmem:[%s3519_s4 + $0x78] sm:$0xff] }
  0x2b   : > { %1855 = vmatprep.mubr.f32.mxu0 %v2234_v0 }
  0x2d   : > { %619 = vperm.xlu0 %2080, %v561_v32   ;;  %624 = vperm.xlu1 %2081, %v562_v33  }
  0x31   : > { %629 = vperm.xlu0 %2080, %v563_v34   ;;  %634 = vperm.xlu1 %2081, %v564_v35  }
  0x35   : > { %639 = vperm.xlu0 %2080, %v565_v36   ;;  %644 = vperm.xlu1 %2081, %v566_v37  }
  0x39   : > { %1788 = vperm.xlu0 %2080, %v1785_v38  }
  0x90   : > { %v400_v39 = vpop.permute.xlu0 %399  ;;  %v410_v54 = vpop.permute.xlu1 %409 }
  0x94   : > { %v405_v47 = vpop.permute.xlu0 %404  ;;  %v415_v4 = vpop.permute.xlu1 %414 }
  0x98   : > { %v570_v32 = vpop.permute.xlu0 %569  ;;  %v575_v38 = vpop.permute.xlu1 %574 }
  0xf1   : > { %v496_v40 = vpop.f32.mrb[0].mxu0 }
  0xf2   : > { %v497_v42 = vadd.f32 %v496_v40, %v400_v39  ;;  %v498_v43 = vpop.f32.mrb[1].mxu0 }
  0xf3   : > { %v499_v45 = vadd.f32 %v498_v43, %v400_v39 }
  0xf4   : > { %v527_v46 = vadd.f32 %v519_v41, %v497_v42 }
  0xf5   : > { %v502_v48 = vpop.f32.mrb[2].mxu0  ;;  %v528_v50 = vadd.f32 %v520_v44, %v499_v45 }
  0xf6   : > { %v503_v51 = vadd.f32 %v502_v48, %v405_v47  ;;  %v504_v52 = vpop.f32.mrb[3].mxu0 }
  0xf7   : > { %v505_v55 = vadd.f32 %v504_v52, %v405_v47 }
  0xf8   : > { %v529_v56 = vadd.f32 %v521_v49, %v503_v51 }
  0xf9   : > { %v508_v57 = vpop.f32.mrb[4].mxu0  ;;  %v530_v59 = vadd.f32 %v522_v53, %v505_v55 }
  0xfa   : > { %v509_v60 = vadd.f32 %v508_v57, %v410_v54  ;;  %v510_v61 = vpop.f32.mrb[5].mxu0  ;;  %v2015_v63 = vpack.c.bf16 %v529_v56, %v527_v46 }
  0xfb   : > { %v511_v1 = vadd.f32 %v510_v61, %v410_v54  ;;  %v2013_v2 = vpack.c.bf16 %v530_v59, %v528_v50  ;;  %v580_v54 = vpop.permute.xlu0 %579 }
  0xfc   : > { %v531_v3 = vadd.f32 %v523_v58, %v509_v60 }
  0xfd   : > { %v532_v5 = vadd.f32 %v524_v62, %v511_v1  ;;  %v514_v6 = vpop.f32.mrb[6].mxu0  ;;  %2014 = vmatprep.subr.bf16.mxu1 %v2013_v2 }
  0xfe   : > { %v515_v8 = vadd.f32 %v514_v6, %v415_v4  ;;  %v516_v9 = vpop.f32.mrb[7].mxu0  ;;  %2016 = vmatpush1.bf16.msra.mxu1 %v2015_v63 }
  0xff   : > { %v517_v11 = vadd.f32 %v516_v9, %v415_v4 }
 0x100   : > { %v533_v12 = vadd.f32 %v525_v7, %v515_v8  ;;  %v585_v7 = vpop.permute.xlu1 %584 }
 0x101   : > { %v534_v13 = vadd.f32 %v526_v10, %v517_v11 }
 0x102   : > { %v2019_v14 = vpack.c.bf16 %v533_v12, %v531_v3 }
 0x103   : > { %v2017_v15 = vpack.c.bf16 %v534_v13, %v532_v5 }
 0x105   : > { %2018 = vmatprep.subr.bf16.mxu1 %v2017_v15 }
 0x106   : > { %2020 = vmatpush1.bf16.msra.mxu1 %v2019_v14 }
 0x109   : > { %1984 = vmatmul.mubr.msk.f32.vlgmr.msra.gmra.mrb[0].mxu1 %vm417_vm0, %v535_v16 }
 0x10a   : > { %765 = vmatprep.mubr.f32.mxu1 %v2234_v0 }
 0x10d   : > { %1985 = vmatmul.mubr.msk.f32.gmra.mrb[2].mxu1 %vm417_vm0, %v536_v17 }
 0x10e   : > { %771 = vmatprep.mubr.f32.mxu1 %v2234_v0 }
 0x111   : > { %1986 = vmatmul.mubr.msk.f32.gmra.mrb[4].mxu1 %vm417_vm0, %v537_v18 }
 0x112   : > { %777 = vmatprep.mubr.f32.mxu1 %v2234_v0 }
 0x115   : > { %1987 = vmatmul.mubr.msk.f32.gmra.mrb[6].mxu1 %vm417_vm0, %v538_v19 }
 0x116   : > { %783 = vmatprep.mubr.f32.mxu1 %v2234_v0 }
 0x119   : > { %1988 = vmatmul.mubr.msk.f32.gmra.mrb[8].mxu1 %vm417_vm0, %v539_v20 }
 0x11a   : > { %789 = vmatprep.mubr.f32.mxu1 %v2234_v0 }
 0x11d   : > { %1989 = vmatmul.mubr.msk.f32.gmra.mrb[10].mxu1 %vm417_vm0, %v540_v21 }
 0x11e   : > { %795 = vmatprep.mubr.f32.mxu1 %v2234_v0 }
 0x121   : > { %1990 = vmatmul.mubr.msk.f32.gmra.mrb[12].mxu1 %vm417_vm0, %v541_v22 }
 0x122   : > { %801 = vmatprep.mubr.f32.mxu1 %v2234_v0 }
 0x125   : > { %1991 = vmatmul.mubr.msk.f32.gmra.mrb[14].mxu1 %vm417_vm0, %v542_v23  ;;  %v3524_v23 = vmov -1.0  }
 0x126   : > { %807 = vmatprep.mubr.f32.mxu1 %v2234_v0 }
 0x129   : > { %1992 = vmatmul.mubr.msk.f32.gmra.mrb[16].mxu1 %vm417_vm0, %v543_v24 }
 0x12a   : > { %813 = vmatprep.mubr.f32.mxu1 %v2234_v0 }
 0x12d   : > { %1993 = vmatmul.mubr.msk.f32.gmra.mrb[18].mxu1 %vm417_vm0, %v544_v25 }
 0x12e   : > { %819 = vmatprep.mubr.f32.mxu1 %v2234_v0 }
 0x131   : > { %1994 = vmatmul.mubr.msk.f32.gmra.mrb[20].mxu1 %vm417_vm0, %v545_v26 }
 0x132   : > { %825 = vmatprep.mubr.f32.mxu1 %v2234_v0 }
 0x135   : > { %1995 = vmatmul.mubr.msk.f32.gmra.mrb[22].mxu1 %vm417_vm0, %v546_v27 }
 0x136   : > { %831 = vmatprep.mubr.f32.mxu1 %v2234_v0 }
 0x139   : > { %1996 = vmatmul.mubr.msk.f32.gmra.mrb[24].mxu1 %vm417_vm0, %v547_v28 }
 0x13a   : > { %837 = vmatprep.mubr.f32.mxu1 %v2234_v0 }
 0x13d   : > { %1997 = vmatmul.mubr.msk.f32.gmra.mrb[26].mxu1 %vm417_vm0, %v548_v29 }
 0x13e   : > { %843 = vmatprep.mubr.f32.mxu1 %v2234_v0 }
 0x141   : > { %1998 = vmatmul.mubr.msk.f32.gmra.mrb[28].mxu1 %vm417_vm0, %v549_v30 }
 0x142   : > { %849 = vmatprep.mubr.f32.mxu1 %v2234_v0 }
 0x145   : > { %1999 = vmatmul.mubr.msk.f32.gmra.mrb[30].mxu1 %vm417_vm0, %v550_v31 }
 0x1dc   : > { %v761_v33 = vpop.f32.mrb[0].mxu1 }
 0x1dd   : > { %v762_v34 = vadd.f32 %v761_v33, %v570_v32  ;;  %v763_v35 = vpop.f32.mrb[1].mxu1 }
 0x1de   : > { %v764_v36 = vadd.f32 %v763_v35, %v570_v32 }
 0x1df   : > { %v888_v37 = vmul.f32 0.70710677, %v762_v34  ;;  %v2546_v20 = vmul.f32 0.5, %v762_v34 }
 0x1e0   : > { %v889_v39 = vmul.f32 0.70710677, %v764_v36  ;;  %v767_v40 = vpop.f32.mrb[2].mxu1  ;;  %v2555_v26 = vmul.f32 0.5, %v764_v36 }
 0x1e1   : > { %v2487_v41 = vand.u32 2147483647, %v888_v37  ;;  %v2489_v42 = vadd.f32 %v767_v40, %v575_v38  ;;  %v769_v0 = vpop.f32.mrb[3].mxu1  ;;  %vm920_vm1 = vcmp.ge.f32.partialorder %v888_v37, 0.0 }
 0x1e2   : > { %v2491_v43 = vand.u32 2147483647, %v889_v39  ;;  %v2493_v44 = vadd.f32 %v769_v0, %v575_v38  ;;  %vm921_vm2 = vcmp.ge.f32.partialorder %v889_v39, 0.0  ;;  %v2553_v24 = vsel %vm920_vm1, 1.0, %v3524_v23 }
 0x1e3   : > { %v1016_v45 = vmul.f32 0.3275911, %v2487_v41  ;;  %v2498_v47 = vmul.f32 0.70710677, %v2489_v42  ;;  %v1496_v17 = vsub.f32 0.0, %v2487_v41  ;;  %v2562_v28 = vsel %vm921_vm2, 1.0, %v3524_v23 }
 0x1e4   : > { %v1017_v46 = vmul.f32 0.3275911, %v2491_v43  ;;  %v2501_v49 = vmul.f32 0.70710677, %v2493_v44  ;;  %v773_v50 = vpop.f32.mrb[4].mxu1  ;;  %v1497_v30 = vsub.f32 0.0, %v2491_v43 }
 0x1e5   : > { %v1048_v48 = vadd.f32 1.0, %v1016_v45  ;;  %v2504_v52 = vand.u32 2147483647, %v2498_v47  ;;  %v775_v53 = vpop.f32.mrb[5].mxu1  ;;  %v2510_v58 = vadd.f32 %v773_v50, %v580_v54  ;;  %v1528_v35 = vmul.f32 %v1496_v17, %v2487_v41 }
 0x1e6   : > { %v1049_v51 = vadd.f32 1.0, %v1017_v46  ;;  %v2508_v57 = vand.u32 2147483647, %v2501_v49  ;;  %v2512_v61 = vadd.f32 %v775_v53, %v580_v54  ;;  %v2574_v36 = vmul.f32 0.5, %v2489_v42 }
 0x1e7   : > { %2082 = vrcp.f32 %v1048_v48  ;;  %v1018_v55 = vmul.f32 0.3275911, %v2504_v52  ;;  %v2516_v63 = vmul.f32 0.70710677, %v2510_v58  ;;  %v1498_v40 = vsub.f32 0.0, %v2504_v52 }
 0x1e8   : > { %2084 = vrcp.f32 %v1049_v51  ;;  %v779_v56 = vpop.f32.mrb[6].mxu1  ;;  %v1019_v62 = vmul.f32 0.3275911, %v2508_v57  ;;  %v2519_v1 = vmul.f32 0.70710677, %v2512_v61  ;;  %v2585_v46 = vmul.f32 0.5, %v2493_v44 }
 0x1e9   : > { %v781_v59 = vpop.f32.mrb[7].mxu1  ;;  %v1050_v60 = vadd.f32 1.0, %v1018_v55  ;;  %v2524_v4 = vand.u32 2147483647, %v2516_v63  ;;  %v2533_v10 = vadd.f32 %v779_v56, %v585_v7  ;;  %vm922_vm3 = vcmp.ge.f32.partialorder %v2498_v47, 0.0 }
 0x1ea   : > { %v1051_v3 = vadd.f32 1.0, %v1019_v62  ;;  %v2529_v6 = vand.u32 2147483647, %v2519_v1  ;;  %v2544_v19 = vadd.f32 %v781_v59, %v585_v7  ;;  %v1560_v59 = vmul.f32 1.442695, %v1528_v35 }
 0x1eb   : > { %2086 = vrcp.f32 %v1050_v60  ;;  %v1020_v8 = vmul.f32 0.3275911, %v2524_v4  ;;  %v2550_v22 = vmul.f32 0.70710677, %v2533_v10  ;;  %vm923_vm4 = vcmp.ge.f32.partialorder %v2501_v49, 0.0 }
 0x1ec   : > { %v2521_v2 = vpop.f32.mrb[8].mxu1  ;;  %2088 = vrcp.f32 %v1051_v3  ;;  %v1021_v9 = vmul.f32 0.3275911, %v2529_v6  ;;  %v2577_v37 = vmul.f32 0.70710677, %v2544_v19  ;;  %vm924_vm5 = vcmp.ge.f32.partialorder %v2516_v63, 0.0  ;;  %v595_v63 = vpop.permute.xlu1 %594 }
 0x1ed   : > { %v2526_v5 = vpop.f32.mrb[9].mxu1  ;;  %v2537_v13 = vadd.f32 1.0, %v1020_v8  ;;  %v2566_v31 = vand.u32 2147483647, %v2550_v22  ;;  %v1530_v8 = vmul.f32 %v1498_v40, %v2504_v52  ;;  %vm925_vm6 = vcmp.ge.f32.partialorder %v2519_v1, 0.0 }
 0x1ee   : > { %v2542_v18 = vadd.f32 1.0, %v1021_v9  ;;  %v2588_v41 = vand.u32 2147483647, %v2577_v37  ;;  %vm926_vm7 = vcmp.ge.f32.partialorder %v2550_v22, 0.0  ;;  %vm927_vm8 = vcmp.ge.f32.partialorder %v2577_v37, 0.0 }
 0x1ef   : > { %2090 = vrcp.f32 %v2537_v13  ;;  %v1022_v0 = vmul.f32 0.3275911, %v2566_v31  ;;  %v1564_v40 = vmul.f32 1.442695, %v1530_v8 }
 0x1f0   : > { %v2535_v11 = vpop.f32.mrb[10].mxu1  ;;  %2092 = vrcp.f32 %v2542_v18  ;;  %v1023_v44 = vmul.f32 0.3275911, %v2588_v41 }
 0x1f1   : > { %v2083_v12 = vpop.eup %2082  ;;  %v2539_v14 = vpop.f32.mrb[11].mxu1  ;;  %v1054_v54 = vadd.f32 1.0, %v1022_v0 }
 0x1f2   : > { %v2085_v15 = vpop.eup %2084  ;;  %v1112_v16 = vmul.f32 %v2083_v12, %v1048_v48 }
 0x1f3   : > { %v1113_v21 = vmul.f32 %v2085_v15, %v1049_v51  ;;  %v1529_v51 = vmul.f32 %v1497_v30, %v2491_v43  ;;  %2094 = vrcp.f32 %v1054_v54  ;;  %v1499_v43 = vsub.f32 0.0, %v2508_v57 }
 0x1f4   : > { %v1144_v25 = vsub.f32 2.0, %v1112_v16  ;;  %v2558_v27 = vpop.f32.mrb[12].mxu1 }
 0x1f5   : > { %v1145_v29 = vsub.f32 2.0, %v1113_v21  ;;  %v2568_v32 = vpop.f32.mrb[13].mxu1  ;;  %v2087_v33 = vpop.eup %2086 }
 0x1f6   : > { %v2570_v34 = vmul.f32 %v2083_v12, %v1144_v25  ;;  %v1114_v39 = vmul.f32 %v2087_v33, %v1050_v60  ;;  %v2089_v48 = vpop.eup %2088  ;;  %v1500_v25 = vsub.f32 0.0, %v2524_v4 }
 0x1f7   : > { %v2579_v38 = vmul.f32 %v2085_v15, %v1145_v29  ;;  %v1115_v60 = vmul.f32 %v2089_v48, %v1051_v3  ;;  %v2602_v15 = vadd.f32 1.0, %v1023_v44 }
 0x1f8   : > { %v1208_v45 = vmul.f32 1.0614054, %v2570_v34  ;;  %v2590_v42 = vpop.f32.mrb[14].mxu1  ;;  %v1146_v53 = vsub.f32 2.0, %v1114_v39 }
 0x1f9   : > { %v1209_v50 = vmul.f32 1.0614054, %v2579_v38  ;;  %v2594_v55 = vpop.f32.mrb[15].mxu1  ;;  %v1147_v12 = vsub.f32 2.0, %v1115_v60  ;;  %v2091_v17 = vpop.eup %2090  ;;  %2096 = vrcp.f32 %v2602_v15 }
 0x1fa   : > { %v1240_v56 = vadd.f32 -1.4531521, %v1208_v45  ;;  %v2597_v7 = vmul.f32 %v2087_v33, %v1146_v53  ;;  %v2093_v29 = vpop.eup %2092  ;;  %v1116_v35 = vmul.f32 %v2091_v17, %v2537_v13  ;;  %2098 = vpow2.f32 %v1560_v59 }
 0x1fb   : > { %v1241_v62 = vadd.f32 -1.4531521, %v1209_v50  ;;  %v2612_v33 = vmul.f32 %v2089_v48, %v1147_v12  ;;  %v1117_v0 = vmul.f32 %v2093_v29, %v2542_v18  ;;  %v1531_v53 = vmul.f32 %v1499_v43, %v2508_v57 }
 0x1fc   : > { %v1272_v9 = vmul.f32 %v1240_v56, %v2570_v34  ;;  %v2604_v16 = vpop.f32.mrb[16].mxu1  ;;  %v1210_v21 = vmul.f32 1.0614054, %v2597_v7  ;;  %v1148_v56 = vsub.f32 2.0, %v1116_v35  ;;  %v1532_v13 = vmul.f32 %v1500_v25, %v2524_v4 }
 0x1fd   : > { %v1273_v3 = vmul.f32 %v1241_v62, %v2579_v38  ;;  %v2610_v52 = vpop.f32.mrb[17].mxu1  ;;  %v1211_v50 = vmul.f32 1.0614054, %v2612_v33  ;;  %v1149_v62 = vsub.f32 2.0, %v1117_v0  ;;  %v2629_v18 = vsel %vm922_vm3, 1.0, %v3524_v23  ;;  %v2095_v47 = vpop.eup %2094 }
 0x1fe   : > { %v1304_v30 = vadd.f32 1.4214138, %v1272_v9  ;;  %v1242_v39 = vadd.f32 -1.4531521, %v1210_v21  ;;  %v2631_v12 = vmul.f32 %v2091_v17, %v1148_v56  ;;  %v1562_v57 = vmul.f32 1.442695, %v1529_v51  ;;  %v2649_v56 = vpop.permute.xlu0 %589 }
 0x1ff   : > { %v1305_v48 = vadd.f32 1.4214138, %v1273_v3  ;;  %v1243_v9 = vadd.f32 -1.4531521, %v1211_v50  ;;  %2100 = vpow2.f32 %v1564_v40  ;;  %v2633_v3 = vmul.f32 %v2093_v29, %v1149_v62 }
 0x200   : > { %v1336_v45 = vmul.f32 %v1304_v30, %v2570_v34  ;;  %v2620_v60 = vpop.f32.mrb[18].mxu1  ;;  %v1274_v44 = vmul.f32 %v1242_v39, %v2597_v7  ;;  %v2637_v25 = vmul.f32 1.442695, %v1531_v53  ;;  %v1212_v30 = vmul.f32 1.0614054, %v2631_v12 }
 0x201   : > { %v2624_v59 = vpop.f32.mrb[19].mxu1  ;;  %v1275_v4 = vmul.f32 %v1243_v9, %v2612_v33  ;;  %v1337_v39 = vmul.f32 %v1305_v48, %v2579_v38  ;;  %v1568_v51 = vmul.f32 1.442695, %v1532_v13  ;;  %v1213_v40 = vmul.f32 1.0614054, %v2633_v3 }
 0x202   : > { %v1368_v8 = vadd.f32 -0.28449672, %v1336_v45  ;;  %v1306_v43 = vadd.f32 1.4214138, %v1274_v44  ;;  %v1244_v45 = vadd.f32 -1.4531521, %v1212_v30  ;;  %v1118_v50 = vmul.f32 %v2095_v47, %v1054_v54 }
 0x203   : > { %v1502_v53 = vsub.f32 0.0, %v2566_v31  ;;  %v1307_v62 = vadd.f32 1.4214138, %v1275_v4  ;;  %v2097_v48 = vpop.eup %2096  ;;  %v1369_v30 = vadd.f32 -0.28449672, %v1337_v39  ;;  %2102 = vpow2.f32 %v1568_v51 }
 0x204   : > { %v1400_v21 = vmul.f32 %v1368_v8, %v2570_v34  ;;  %v2640_v35 = vpop.f32.mrb[20].mxu1  ;;  %v1338_v17 = vmul.f32 %v1306_v43, %v2597_v7  ;;  %v1245_v8 = vadd.f32 -1.4531521, %v1213_v40  ;;  %v1276_v13 = vmul.f32 %v1244_v45, %v2631_v12  ;;  %v2099_v54 = vpop.eup %2098 }
 0x205   : > { %3533 = vst [vmem:[#allocation2_spill] sm:$0xff] %v2640_v35  ;;  %v2645_v29 = vpop.f32.mrb[21].mxu1  ;;  %v1150_v43 = vsub.f32 2.0, %v1118_v50  ;;  %v1119_v4 = vmul.f32 %v2097_v48, %v2602_v15  ;;  %2104 = vpow2.f32 %v1562_v57 }
 0x206   : > { %3534 = vst [vmem:[#allocation3_spill] sm:$0xff] %v2645_v29  ;;  %v1432_v0 = vadd.f32 0.2548296, %v1400_v21  ;;  %v1370_v44 = vadd.f32 -0.28449672, %v1338_v17  ;;  %v2655_v21 = vadd.f32 %v2521_v2, %v2649_v56  ;;  %v1277_v17 = vmul.f32 %v1245_v8, %v2633_v3 }
 0x207   : > { %v2664_v45 = vmul.f32 %v2095_v47, %v1150_v43  ;;  %v1339_v2 = vmul.f32 %v1307_v62, %v2612_v33  ;;  %v1151_v35 = vsub.f32 2.0, %v1119_v4  ;;  %v1401_v47 = vmul.f32 %v1369_v30, %v2579_v38 }
 0x208   : > { %v1464_v9 = vmul.f32 %v1432_v0, %v2570_v34  ;;  %v2657_v23 = vpop.f32.mrb[22].mxu1  ;;  %v1402_v29 = vmul.f32 %v1370_v44, %v2597_v7  ;;  %v1308_v0 = vadd.f32 1.4214138, %v1276_v13  ;;  %v2671_v15 = vmul.f32 0.70710677, %v2655_v21 }
 0x209   : > { %3535 = vst [vmem:[#allocation4_spill] sm:$0xff] %v2657_v23  ;;  %v2662_v40 = vpop.f32.mrb[23].mxu1  ;;  %v1534_v23 = vmul.f32 %v1502_v53, %v2566_v31  ;;  %v1214_v8 = vmul.f32 1.0614054, %v2664_v45  ;;  %v2677_v62 = vmul.f32 %v2097_v48, %v1151_v35  ;;  %v1501_v13 = vsub.f32 0.0, %v2529_v6 }
 0x20a   : > { %3536 = vst [vmem:[#allocation5_spill] sm:$0xff] %v2662_v40  ;;  %v1624_v34 = vmul.f32 %v2099_v54, %v1464_v9  ;;  %v1434_v50 = vadd.f32 0.2548296, %v1402_v29  ;;  %v1340_v44 = vmul.f32 %v1308_v0, %v2631_v12  ;;  %v2101_v9 = vpop.eup %2100  ;;  %v1309_v29 = vadd.f32 1.4214138, %v1277_v17 }
 0x20b   : > { %v1246_v43 = vadd.f32 -1.4531521, %v1214_v8  ;;  %v1572_v0 = vmul.f32 1.442695, %v1534_v23  ;;  %v2687_v35 = vand.u32 2147483647, %v2671_v15  ;;  %2106 = vpow2.f32 %v2637_v25 }
 0x20c   : > { %v1656_v39 = vsub.f32 1.0, %v1624_v34  ;;  %v2673_v40 = vpop.f32.mrb[24].mxu1  ;;  %v1466_v51 = vmul.f32 %v1434_v50, %v2597_v7  ;;  %v1372_v53 = vadd.f32 -0.28449672, %v1340_v44  ;;  %v1371_v34 = vadd.f32 -0.28449672, %v1339_v2 }
 0x20d   : > { %3537 = vst [vmem:[#allocation6_spill] sm:$0xff] %v2673_v40  ;;  %v2679_v31 = vpop.f32.mrb[25].mxu1  ;;  %v1278_v30 = vmul.f32 %v1246_v43, %v2664_v45  ;;  %v1215_v7 = vmul.f32 1.0614054, %v2677_v62  ;;  %v1433_v57 = vadd.f32 0.2548296, %v1401_v47  ;;  %v1341_v23 = vmul.f32 %v1309_v29, %v2633_v3  ;;  %v2103_v47 = vpop.eup %2102 }
 0x20e   : > { %v1688_v54 = vmul.f32 %v1656_v39, %v2553_v24  ;;  %v1626_v4 = vmul.f32 %v2101_v9, %v1466_v51  ;;  %v1404_v40 = vmul.f32 %v1372_v53, %v2631_v12  ;;  %v3539_v50 = vmov -1.0  }
 0x20f   : > { %v2694_v24 = vsel %vm923_vm4, 1.0, %v3539_v50  ;;  %v1533_v39 = vmul.f32 %v1501_v13, %v2529_v6  ;;  %v1310_v44 = vadd.f32 1.4214138, %v1278_v30  ;;  %v1403_v51 = vmul.f32 %v1371_v34, %v2612_v33 }
 0x210   : > { %v2689_v48 = vpop.f32.mrb[26].mxu1  ;;  %v1658_v17 = vsub.f32 1.0, %v1626_v4  ;;  %v1436_v2 = vadd.f32 0.2548296, %v1404_v40  ;;  %v1720_v8 = vadd.f32 1.0, %v1688_v54  ;;  %2108 = vpow2.f32 %v1572_v0 }
 0x211   : > { %3538 = vst [vmem:[#allocation7_spill] sm:$0xff] %v2689_v48  ;;  %v1342_v49 = vmul.f32 %v1310_v44, %v2664_v45  ;;  %v1247_v43 = vadd.f32 -1.4531521, %v1215_v7  ;;  %v1024_v29 = vmul.f32 0.3275911, %v2687_v35  ;;  %v1465_v25 = vmul.f32 %v1433_v57, %v2579_v38  ;;  %v2708_v54 = vpop.f32.mrb[27].mxu1 }
 0x212   : > { %v1690_v9 = vmul.f32 %v1658_v17, %v2629_v18  ;;  %v1468_v53 = vmul.f32 %v1436_v2, %v2631_v12  ;;  %v2706_v6 = vmul.f32 0.5, %v2510_v58  ;;  %v1373_v13 = vadd.f32 -0.28449672, %v1341_v23  ;;  %3540 = vst [vmem:[#allocation8_spill] sm:$0xff] %v2708_v54  ;;  %v2105_v58 = vpop.eup %2104 }
 0x213   : > { %v1570_v4 = vmul.f32 1.442695, %v1533_v39  ;;  %v1374_v34 = vadd.f32 -0.28449672, %v1342_v49  ;;  %v1056_v0 = vadd.f32 1.0, %v1024_v29  ;;  %v2711_v12 = vmul.f32 %v1720_v8, %v2546_v20 }
 0x214   : > { %v1722_v40 = vadd.f32 1.0, %v1690_v9  ;;  %v1628_v18 = vmul.f32 %v2103_v47, %v1468_v53  ;;  %v1435_v7 = vadd.f32 0.2548296, %v1403_v51  ;;  %v2718_v38 = vadd.f32 %v2526_v5, %v2649_v56 }
 0x215   : > { %3541 = vst [vmem:[#allocation9_spill] sm:$0xff] %v2711_v12  ;;  %v1406_v57 = vmul.f32 %v1374_v34, %v2664_v45  ;;  %v1279_v17 = vmul.f32 %v1247_v43, %v2677_v62  ;;  %2110 = vrcp.f32 %v1056_v0  ;;  %v1625_v23 = vmul.f32 %v2105_v58, %v1465_v25  ;;  %v2107_v51 = vpop.eup %2106 }
 0x216   : > { %v2714_v30 = vmul.f32 %v1722_v40, %v2574_v36  ;;  %v1405_v36 = vmul.f32 %v1373_v13, %v2633_v3  ;;  %v1503_v2 = vsub.f32 0.0, %v2588_v41  ;;  %v1660_v39 = vsub.f32 1.0, %v1628_v18 }
 0x217   : > { %v2728_v5 = vmul.f32 0.5, %v2512_v61  ;;  %2112 = vpow2.f32 %v1570_v4  ;;  %v1438_v56 = vadd.f32 0.2548296, %v1406_v57  ;;  %v1467_v44 = vmul.f32 %v1435_v7, %v2612_v33 }
 0x218   : > { %3542 = vst [vmem:[#allocation10_spill] sm:$0xff] %v2714_v30  ;;  %v956_v8 = vsel %vm924_vm5, 1.0, %v3539_v50  ;;  %v2734_v9 = vmul.f32 0.70710677, %v2718_v38  ;;  %v1311_v53 = vadd.f32 1.4214138, %v1279_v17  ;;  %v2739_v61 = vadd.f32 %v2535_v11, %v595_v63 }
 0x219   : > { %v1470_v47 = vmul.f32 %v1438_v56, %v2664_v45  ;;  %v1657_v43 = vsub.f32 1.0, %v1625_v23  ;;  %v1437_v29 = vadd.f32 0.2548296, %v1405_v36  ;;  %v1535_v33 = vmul.f32 %v1503_v2, %v2588_v41  ;;  %v2751_v45 = vpop.f32.mrb[28].mxu1  ;;  %v600_v2 = vpop.permute.xlu0 %599 }
 0x21a   : > { %v2109_v49 = vpop.eup %2108  ;;  %v2743_v25 = vand.u32 2147483647, %v2734_v9  ;;  %v1692_v1 = vmul.f32 %v1660_v39, %v956_v8  ;;  %v2746_v40 = vsel %vm925_vm6, 1.0, %v3539_v50  ;;  %v2749_v18 = vadd.f32 %v2539_v14, %v595_v63  ;;  %3543 = vst [vmem:[#allocation11_spill] sm:$0xff] %v2751_v45 }
 0x21b   : > { %v1630_v13 = vmul.f32 %v2109_v49, %v1470_v47  ;;  %v1627_v11 = vmul.f32 %v2107_v51, %v1467_v44  ;;  %v862_v4 = vmul.f32 0.5, %v2533_v10  ;;  %v2755_v34 = vmul.f32 0.5, %v2544_v19 }
 0x21c   : > { %v1025_v41 = vmul.f32 0.3275911, %v2743_v25  ;;  %v958_v7 = vsel %vm926_vm7, 1.0, %v3539_v50  ;;  %v1343_v57 = vmul.f32 %v1311_v53, %v2677_v62  ;;  %v2763_v14 = vmul.f32 0.70710677, %v2739_v61 }
 0x21d   : > { %v1662_v58 = vsub.f32 1.0, %v1630_v13  ;;  %v1689_v17 = vmul.f32 %v1657_v43, %v2562_v28  ;;  %v1469_v23 = vmul.f32 %v1437_v29, %v2633_v3  ;;  %v1574_v10 = vmul.f32 1.442695, %v1535_v33  ;;  %v2776_v28 = vpop.f32.mrb[29].mxu1 }
 0x21e   : > { %v1057_v36 = vadd.f32 1.0, %v1025_v41  ;;  %v1724_v39 = vadd.f32 1.0, %v1692_v1  ;;  %v2768_v63 = vand.u32 2147483647, %v2763_v14  ;;  %v2771_v22 = vmul.f32 0.70710677, %v2749_v18 }
 0x21f   : > { %v2111_v19 = vpop.eup %2110  ;;  %v1694_v56 = vmul.f32 %v1662_v58, %v958_v7  ;;  %v1659_v44 = vsub.f32 1.0, %v1627_v11  ;;  %v2774_v51 = vadd.f32 %v2558_v27, %v600_v2  ;;  %3544 = vst [vmem:[#allocation12_spill] sm:$0xff] %v2776_v28  ;;  %v1375_v53 = vadd.f32 -0.28449672, %v1343_v57 }
 0x220   : > { %v1120_v8 = vmul.f32 %v2111_v19, %v1056_v0  ;;  %2114 = vrcp.f32 %v1057_v36  ;;  %v1026_v49 = vmul.f32 0.3275911, %v2768_v63  ;;  %vm928_vm9 = vcmp.ge.f32.partialorder %v2671_v15, 0.0 }
 0x221   : > { %v2113_v3 = vpop.eup %2112  ;;  %v1726_v47 = vadd.f32 1.0, %v1694_v56  ;;  %v1504_v33 = vsub.f32 0.0, %v2687_v35  ;;  %v2783_v0 = vmul.f32 %v1724_v39, %v2706_v6  ;;  %v2788_v13 = vand.u32 2147483647, %v2771_v22 }
 0x222   : > { %v1629_v43 = vmul.f32 %v2113_v3, %v1469_v23  ;;  %v1152_v29 = vsub.f32 2.0, %v1120_v8  ;;  %v1058_v1 = vadd.f32 1.0, %v1026_v49  ;;  %v1721_v11 = vadd.f32 1.0, %v1689_v17 }
 0x223   : > { %3545 = vst [vmem:[#allocation13_spill] sm:$0xff] %v2783_v0  ;;  %v2785_v27 = vmul.f32 %v1726_v47, %v862_v4  ;;  %v1691_v41 = vmul.f32 %v1659_v44, %v2694_v24  ;;  %v2794_v58 = vmul.f32 0.70710677, %v2774_v51  ;;  %v1407_v6 = vmul.f32 %v1375_v53, %v2677_v62 }
 0x224   : > { %v2791_v7 = vmul.f32 %v2111_v19, %v1152_v29  ;;  %2116 = vrcp.f32 %v1058_v1  ;;  %v1027_v4 = vmul.f32 0.3275911, %v2788_v13  ;;  %v2803_v23 = vsel %vm927_vm8, 1.0, %v3539_v50  ;;  %v2807_v19 = vpop.f32.mrb[30].mxu1 }
 0x225   : > { %3546 = vst [vmem:[#allocation14_spill] sm:$0xff] %v2785_v27  ;;  %2118 = vpow2.f32 %v1574_v10  ;;  %v1536_v17 = vmul.f32 %v1504_v33, %v2687_v35  ;;  %3547 = vst [vmem:[#allocation15_spill] sm:$0xff] %v2807_v19  ;;  %v1661_v39 = vsub.f32 1.0, %v1629_v43  ;;  %v2810_v56 = vmul.f32 0.5, %v2655_v21  ;;  %v605_v35 = vpop.permute.xlu1 %604 }
 0x226   : > { %v1216_v24 = vmul.f32 1.0614054, %v2791_v7  ;;  %v1059_v44 = vadd.f32 1.0, %v1027_v4  ;;  %v2813_v8 = vand.u32 2147483647, %v2794_v58  ;;  %v1723_v3 = vadd.f32 1.0, %v1691_v41 }
 0x227   : > { %v2818_v37 = vsel %vm928_vm9, 1.0, %v3539_v50  ;;  %v2821_v47 = vadd.f32 %v2568_v32, %v600_v2  ;;  %v2824_v53 = vmul.f32 %v1721_v11, %v2555_v26  ;;  %v1439_v21 = vadd.f32 0.2548296, %v1407_v6 }
 0x228   : > { %v1248_v10 = vadd.f32 -1.4531521, %v1216_v24  ;;  %2120 = vrcp.f32 %v1059_v44  ;;  %v1028_v49 = vmul.f32 0.3275911, %v2813_v8  ;;  %v1576_v33 = vmul.f32 1.442695, %v1536_v17 }
 0x229   : > { %3548 = vst [vmem:[#allocation16_spill] sm:$0xff] %v2824_v53  ;;  %v2829_v15 = vmul.f32 0.70710677, %v2821_v47  ;;  %v2832_v41 = vadd.f32 %v2590_v42, %v605_v35  ;;  %v1693_v32 = vmul.f32 %v1661_v39, %v2746_v40  ;;  %v2836_v2 = vmul.f32 0.5, %v2718_v38  ;;  %v2845_v17 = vpop.f32.mrb[31].mxu1 }
 0x22a   : > { %v2115_v43 = vpop.eup %2114  ;;  %v1280_v29 = vmul.f32 %v1248_v10, %v2791_v7  ;;  %v1060_v11 = vadd.f32 1.0, %v1028_v49  ;;  %v2839_v6 = vmul.f32 %v1723_v3, %v2585_v46  ;;  %vm929_vm10 = vcmp.ge.f32.partialorder %v2734_v9, 0.0  ;;  %3550 = vst [vmem:[#allocation18_spill] sm:$0xff] %v2845_v17 }
 0x22b   : > { %v1121_v26 = vmul.f32 %v2115_v43, %v1057_v36  ;;  %v2843_v24 = vand.u32 2147483647, %v2829_v15  ;;  %v1471_v42 = vmul.f32 %v1439_v21, %v2677_v62  ;;  %v1505_v40 = vsub.f32 0.0, %v2743_v25 }
 0x22c   : > { %3549 = vst [vmem:[#allocation17_spill] sm:$0xff] %v2839_v6  ;;  %v1312_v4 = vadd.f32 1.4214138, %v1280_v29  ;;  %2122 = vrcp.f32 %v1060_v11  ;;  %v2852_v46 = vmul.f32 0.70710677, %v2832_v41  ;;  %v2855_v39 = vadd.f32 %v2594_v55, %v605_v35 }
 0x22d   : > { %v1153_v10 = vsub.f32 2.0, %v1121_v26  ;;  %v1029_v36 = vmul.f32 0.3275911, %v2843_v24  ;;  %v1725_v49 = vadd.f32 1.0, %v1693_v32  ;;  %2124 = vpow2.f32 %v1576_v33 }
 0x22e   : > { %v1344_v38 = vmul.f32 %v1312_v4, %v2791_v7  ;;  %v2117_v3 = vpop.eup %2116  ;;  %v1506_v62 = vsub.f32 0.0, %v2768_v63  ;;  %v2863_v4 = vsel %vm929_vm10, 1.0, %v3539_v50  ;;  %v1537_v35 = vmul.f32 %v1505_v40, %v2743_v25 }
 0x22f   : > { %v2857_v29 = vmul.f32 %v2115_v43, %v1153_v10  ;;  %v2119_v21 = vpop.eup %2118  ;;  %v1122_v57 = vmul.f32 %v2117_v3, %v1058_v1  ;;  %v1061_v20 = vadd.f32 1.0, %v1029_v36  ;;  %v2868_v33 = vand.u32 2147483647, %v2852_v46 }
 0x230   : > { %v1376_v26 = vadd.f32 -0.28449672, %v1344_v38  ;;  %v1631_v0 = vmul.f32 %v2119_v21, %v1471_v42  ;;  %v2871_v43 = vmul.f32 0.5, %v2739_v61  ;;  %v2874_v10 = vmul.f32 0.70710677, %v2855_v39 }
 0x231   : > { %v1217_v55 = vmul.f32 1.0614054, %v2857_v29  ;;  %v1154_v32 = vsub.f32 2.0, %v1122_v57  ;;  %2126 = vrcp.f32 %v1061_v20  ;;  %v2877_v1 = vmul.f32 %v1725_v49, %v2728_v5 }
 0x232   : > { %v2121_v9 = vpop.eup %2120  ;;  %v1408_v42 = vmul.f32 %v1376_v26, %v2791_v7  ;;  %v1538_v38 = vmul.f32 %v1506_v62, %v2768_v63  ;;  %v1030_v25 = vmul.f32 0.3275911, %v2868_v33  ;;  %vm930_vm11 = vcmp.ge.f32.partialorder %v2763_v14, 0.0 }
 0x233   : > { %3551 = vst [vmem:[#allocation19_spill] sm:$0xff] %v2877_v1  ;;  %v1249_v40 = vadd.f32 -1.4531521, %v1217_v55  ;;  %v2883_v61 = vmul.f32 %v2117_v3, %v1154_v32  ;;  %v1123_v57 = vmul.f32 %v2121_v9, %v1059_v44  ;;  %v1663_v36 = vsub.f32 1.0, %v1631_v0 }
 0x234   : > { %v1578_v21 = vmul.f32 1.442695, %v1537_v35  ;;  %v2886_v27 = vmul.f32 0.5, %v2749_v18  ;;  %v1062_v12 = vadd.f32 1.0, %v1030_v25  ;;  %vm931_vm12 = vcmp.ge.f32.partialorder %v2771_v22, 0.0  ;;  %v2904_v25 = vpop.permute.xlu0 %609 }
 0x235   : > { %v1218_v5 = vmul.f32 1.0614054, %v2883_v61  ;;  %v1155_v49 = vsub.f32 2.0, %v1123_v57  ;;  %v2891_v63 = vand.u32 2147483647, %v2874_v10  ;;  %v2894_v14 = vsel %vm930_vm11, 1.0, %v3539_v50 }
 0x236   : > { %v2123_v62 = vpop.eup %2122  ;;  %v1440_v26 = vadd.f32 0.2548296, %v1408_v42  ;;  %v1580_v44 = vmul.f32 1.442695, %v1538_v38  ;;  %2128 = vrcp.f32 %v1062_v12  ;;  %v1281_v0 = vmul.f32 %v1249_v40, %v2857_v29 }
 0x237   : > { %v1250_v18 = vadd.f32 -1.4531521, %v1218_v5  ;;  %v2897_v3 = vmul.f32 %v2121_v9, %v1155_v49  ;;  %v1124_v55 = vmul.f32 %v2123_v62, %v1060_v11  ;;  %v2125_v35 = vpop.eup %2124  ;;  %v1695_v22 = vmul.f32 %v1663_v36, %v2803_v23 }
 0x238   : > { %2130 = vpow2.f32 %v1578_v21  ;;  %v2901_v32 = vsel %vm931_vm12, 1.0, %v3539_v50  ;;  %v1031_v42 = vmul.f32 0.3275911, %v2891_v63  ;;  %v1508_v9 = vsub.f32 0.0, %v2813_v8 }
 0x239   : > { %v1282_v38 = vmul.f32 %v1250_v18, %v2883_v61  ;;  %v1219_v57 = vmul.f32 1.0614054, %v2897_v3  ;;  %v1156_v40 = vsub.f32 2.0, %v1124_v55  ;;  %v1472_v11 = vmul.f32 %v1440_v26, %v2791_v7 }
 0x23a   : > { %v1507_v5 = vsub.f32 0.0, %v2788_v13  ;;  %v1063_v23 = vadd.f32 1.0, %v1031_v42  ;;  %v2913_v36 = vadd.f32 %v2604_v16, %v2904_v25  ;;  %v1313_v49 = vadd.f32 1.4214138, %v1281_v0 }
 0x23b   : > { %v2127_v21 = vpop.eup %2126  ;;  %v1314_v1 = vadd.f32 1.4214138, %v1282_v38  ;;  %2132 = vpow2.f32 %v1580_v44  ;;  %v2915_v30 = vmul.f32 %v2123_v62, %v1156_v40  ;;  %v1251_v18 = vadd.f32 -1.4531521, %v1219_v57 }
 0x23c   : > { %vm932_vm13 = vcmp.ge.f32.partialorder %v2794_v58, 0.0  ;;  %v1125_v55 = vmul.f32 %v2127_v21, %v1061_v20  ;;  %2134 = vrcp.f32 %v1063_v23  ;;  %v1727_v6 = vadd.f32 1.0, %v1695_v22 }
 0x23d   : > { %v1346_v7 = vmul.f32 %v1314_v1, %v2883_v61  ;;  %v1220_v26 = vmul.f32 1.0614054, %v2915_v30  ;;  %v1540_v42 = vmul.f32 %v1508_v9, %v2813_v8  ;;  %v1632_v16 = vmul.f32 %v2125_v35, %v1472_v11 }
 0x23e   : > { %v2922_v53 = vmul.f32 0.5, %v2774_v51  ;;  %v1157_v0 = vsub.f32 2.0, %v1125_v55  ;;  %v2925_v62 = vmul.f32 0.70710677, %v2913_v36  ;;  %v1345_v44 = vmul.f32 %v1313_v49, %v2857_v29 }
 0x23f   : > { %v1378_v58 = vadd.f32 -0.28449672, %v1346_v7  ;;  %v2929_v20 = vsel %vm932_vm13, 1.0, %v3539_v50  ;;  %v1252_v22 = vadd.f32 -1.4531521, %v1220_v26  ;;  %v1283_v38 = vmul.f32 %v1251_v18, %v2897_v3 }
 0x240   : > { %v2129_v1 = vpop.eup %2128  ;;  %v1539_v8 = vmul.f32 %v1507_v5, %v2788_v13  ;;  %v2933_v35 = vmul.f32 %v2127_v21, %v1157_v0  ;;  %v2936_v51 = vand.u32 2147483647, %v2925_v62  ;;  %v1584_v9 = vmul.f32 1.442695, %v1540_v42 }
 0x241   : > { %v1410_v57 = vmul.f32 %v1378_v58, %v2883_v61  ;;  %v1284_v40 = vmul.f32 %v1252_v22, %v2915_v30  ;;  %v1126_v11 = vmul.f32 %v2129_v1, %v1062_v12  ;;  %v1664_v55 = vsub.f32 1.0, %v1632_v16 }
 0x242   : > { %v2940_v49 = vpop.eup %2130  ;;  %v1221_v7 = vmul.f32 1.0614054, %v2933_v35  ;;  %v1510_v18 = vsub.f32 0.0, %v2868_v33  ;;  %v1032_v13 = vmul.f32 0.3275911, %v2936_v51  ;;  %v2946_v5 = vmul.f32 %v1727_v6, %v2755_v34 }
 0x243   : > { %v1377_v21 = vadd.f32 -0.28449672, %v1345_v44  ;;  %v1442_v26 = vadd.f32 0.2548296, %v1410_v57  ;;  %v1316_v0 = vadd.f32 1.4214138, %v1284_v40  ;;  %2136 = vpow2.f32 %v1584_v9 }
 0x244   : > { %v1315_v58 = vadd.f32 1.4214138, %v1283_v38  ;;  %v1253_v17 = vadd.f32 -1.4531521, %v1221_v7  ;;  %v1158_v22 = vsub.f32 2.0, %v1126_v11  ;;  %v1064_v42 = vadd.f32 1.0, %v1032_v13 }
 0x245   : > { %v2133_v12 = vpop.eup %2132  ;;  %v1474_v19 = vmul.f32 %v1442_v26, %v2883_v61  ;;  %v1582_v16 = vmul.f32 1.442695, %v1539_v8  ;;  %v1348_v28 = vmul.f32 %v1316_v0, %v2915_v30  ;;  %v1542_v34 = vmul.f32 %v1510_v18, %v2868_v33 }
 0x246   : > { %v2135_v45 = vpop.eup %2134  ;;  %v1285_v54 = vmul.f32 %v1253_v17, %v2933_v35  ;;  %v2951_v48 = vmul.f32 %v2129_v1, %v1158_v22  ;;  %2138 = vrcp.f32 %v1064_v42  ;;  %v1696_v6 = vmul.f32 %v1664_v55, %v2818_v37 }
 0x247   : > { %v1634_v44 = vmul.f32 %v2133_v12, %v1474_v19  ;;  %v1380_v38 = vadd.f32 -0.28449672, %v1348_v28  ;;  %v1127_v57 = vmul.f32 %v2135_v45, %v1063_v23  ;;  %v1409_v40 = vmul.f32 %v1377_v21, %v2857_v29 }
 0x248   : > { %v1347_v61 = vmul.f32 %v1315_v58, %v2897_v3  ;;  %v1509_v8 = vsub.f32 0.0, %v2843_v24  ;;  %v1222_v9 = vmul.f32 1.0614054, %v2951_v48  ;;  %v1317_v1 = vadd.f32 1.4214138, %v1285_v54 }
 0x249   : > { %v1666_v11 = vsub.f32 1.0, %v1634_v44  ;;  %v1412_v17 = vmul.f32 %v1380_v38, %v2915_v30  ;;  %v1159_v7 = vsub.f32 2.0, %v1127_v57  ;;  %v2961_v33 = vmul.f32 0.5, %v2821_v47 }
 0x24a   : > { %v1254_v37 = vadd.f32 -1.4531521, %v1222_v9  ;;  %v1588_v19 = vmul.f32 1.442695, %v1542_v34  ;;  %v2965_v28 = vadd.f32 %v2610_v52, %v2904_v25  ;;  %v1728_v23 = vadd.f32 1.0, %v1696_v6 }
 0x24b   : > { %v1698_v55 = vmul.f32 %v1666_v11, %v2894_v14  ;;  %v1444_v18 = vadd.f32 0.2548296, %v1412_v17  ;;  %v2968_v13 = vmul.f32 %v2135_v45, %v1159_v7  ;;  %v1441_v21 = vadd.f32 0.2548296, %v1409_v40 }
 0x24c   : > { %2140 = vpow2.f32 %v1582_v16  ;;  %v1541_v54 = vmul.f32 %v1509_v8, %v2843_v24  ;;  %v1286_v26 = vmul.f32 %v1254_v37, %v2951_v48  ;;  %v1379_v0 = vadd.f32 -0.28449672, %v1347_v61  ;;  %v615_v61 = vpop.permute.xlu1 %614 }
 0x24d   : > { %v1730_v47 = vadd.f32 1.0, %v1698_v55  ;;  %v1349_v58 = vmul.f32 %v1317_v1, %v2933_v35  ;;  %v1223_v22 = vmul.f32 1.0614054, %v2968_v13  ;;  %v1476_v52 = vmul.f32 %v1444_v18, %v2915_v30  ;;  %v2137_v25 = vpop.eup %2136 }
 0x24e   : > { %vm933_vm14 = vcmp.ge.f32.partialorder %v2829_v15, 0.0  ;;  %v1318_v14 = vadd.f32 1.4214138, %v1286_v26  ;;  %v2977_v45 = vmul.f32 0.70710677, %v2965_v28  ;;  %v2980_v12 = vmul.f32 %v1728_v23, %v2810_v56 }
 0x24f   : > { %v2983_v24 = vmul.f32 %v1730_v47, %v2871_v43  ;;  %2142 = vpow2.f32 %v1588_v19  ;;  %v1255_v16 = vadd.f32 -1.4531521, %v1223_v22  ;;  %v1473_v6 = vmul.f32 %v1441_v21, %v2857_v29 }
 0x250   : > { %v2139_v34 = vpop.eup %2138  ;;  %v1586_v44 = vmul.f32 1.442695, %v1541_v54  ;;  %v1350_v30 = vmul.f32 %v1318_v14, %v2951_v48  ;;  %v2988_v38 = vand.u32 2147483647, %v2977_v45  ;;  %v1411_v56 = vmul.f32 %v1379_v0, %v2897_v3 }
 0x251   : > { %v1381_v40 = vadd.f32 -0.28449672, %v1349_v58  ;;  %v1287_v43 = vmul.f32 %v1255_v16, %v2968_v13  ;;  %v1636_v8 = vmul.f32 %v2137_v25, %v1476_v52  ;;  %v1511_v11 = vsub.f32 0.0, %v2891_v63 }
 0x252   : > { %v1382_v9 = vadd.f32 -0.28449672, %v1350_v30  ;;  %v1128_v29 = vmul.f32 %v2139_v34, %v1064_v42  ;;  %v2996_v17 = vmul.f32 0.5, %v2832_v41  ;;  %v1033_v7 = vmul.f32 0.3275911, %v2988_v38 }
 0x253   : > { %v1319_v1 = vadd.f32 1.4214138, %v1287_v43  ;;  %v3000_v37 = vadd.f32 %v2620_v60, %v615_v61  ;;  %v1633_v19 = vmul.f32 %v2940_v49, %v1473_v6  ;;  %v3006_v23 = vsel %vm933_vm14, 1.0, %v3539_v50 }
 0x254   : > { %v1414_v55 = vmul.f32 %v1382_v9, %v2951_v48  ;;  %v1160_v18 = vsub.f32 2.0, %v1128_v29  ;;  %v1443_v42 = vadd.f32 0.2548296, %v1411_v56  ;;  %v1413_v41 = vmul.f32 %v1381_v40, %v2933_v35 }
 0x255   : > { %2144 = vpow2.f32 %v1586_v44  ;;  %v1065_v21 = vadd.f32 1.0, %v1033_v7  ;;  %v1668_v26 = vsub.f32 1.0, %v1636_v8  ;;  %v1543_v60 = vmul.f32 %v1511_v11, %v2891_v63 }
 0x256   : > { %v2141_v54 = vpop.eup %2140  ;;  %v1446_v47 = vadd.f32 0.2548296, %v1414_v55  ;;  %v3011_v0 = vmul.f32 %v2139_v34, %v1160_v18  ;;  %v3014_v49 = vmul.f32 0.5, %v2855_v39  ;;  %v1351_v15 = vmul.f32 %v1319_v1, %v2968_v13  ;;  %v3552_v55 = vld [vmem:[#allocation2_spill] sm:$0xff] }
 0x257   : > { %2146 = vrcp.f32 %v1065_v21  ;;  %v3018_v58 = vmul.f32 0.70710677, %v3000_v37  ;;  %v1665_v22 = vsub.f32 1.0, %v1633_v19  ;;  %vm934_vm15 = vcmp.ge.f32.partialorder %v2852_v46, 0.0 }
 0x258   : > { %v1478_v52 = vmul.f32 %v1446_v47, %v2951_v48  ;;  %v1224_v14 = vmul.f32 1.0614054, %v3011_v0  ;;  %v1475_v63 = vmul.f32 %v1443_v42, %v2897_v3  ;;  %v1445_v16 = vadd.f32 0.2548296, %v1413_v41 }
 0x259   : > { %v2143_v25 = vpop.eup %2142  ;;  %v3025_v39 = vand.u32 2147483647, %v3018_v58  ;;  %v3028_v34 = vadd.f32 %v2624_v59, %v615_v61  ;;  %v1700_v6 = vmul.f32 %v1668_v26, %v2929_v20  ;;  %v1590_v30 = vmul.f32 1.442695, %v1543_v60  ;;  %v620_v20 = vpop.permute.xlu0 %619 }
 0x25a   : > { %v1638_v44 = vmul.f32 %v2143_v25, %v1478_v52  ;;  %v1256_v56 = vadd.f32 -1.4531521, %v1224_v14  ;;  %vm935_vm0 = vcmp.ge.f32.partialorder %v2874_v10, 0.0  ;;  %v1383_v48 = vadd.f32 -0.28449672, %v1351_v15 }
 0x25b   : > { %v1512_v40 = vsub.f32 0.0, %v2936_v51  ;;  %v1034_v43 = vmul.f32 0.3275911, %v3025_v39  ;;  %v1697_v3 = vmul.f32 %v1665_v22, %v2863_v4  ;;  %v966_v8 = vsel %vm934_vm15, 1.0, %v3539_v50 }
 0x25c   : > { %v1670_v59 = vsub.f32 1.0, %v1638_v44  ;;  %v1288_v61 = vmul.f32 %v1256_v56, %v3011_v0  ;;  %v1635_v9 = vmul.f32 %v2141_v54, %v1475_v63  ;;  %v1477_v11 = vmul.f32 %v1445_v16, %v2933_v35 }
 0x25d   : > { %v1066_v29 = vadd.f32 1.0, %v1034_v43  ;;  %v3041_v1 = vmul.f32 0.70710677, %v3028_v34  ;;  %v1732_v7 = vadd.f32 1.0, %v1700_v6  ;;  %2148 = vpow2.f32 %v1590_v30  ;;  %v3555_v30 = vld [vmem:[#allocation3_spill] sm:$0xff] }
 0x25e   : > { %v1702_v19 = vmul.f32 %v1670_v59, %v966_v8  ;;  %v3044_v4 = vadd.f32 %v3552_v55, %v620_v20  ;;  %v1415_v46 = vmul.f32 %v1383_v48, %v2968_v13  ;;  %vm936_vm1 = vcmp.ge.f32.partialorder %v2925_v62, 0.0 }
 0x25f   : > { %v2145_v18 = vpop.eup %2144  ;;  %v1544_v42 = vmul.f32 %v1512_v40, %v2936_v51  ;;  %2150 = vrcp.f32 %v1066_v29  ;;  %v1729_v41 = vadd.f32 1.0, %v1697_v3  ;;  %v1320_v54 = vadd.f32 1.4214138, %v1288_v61 }
 0x260   : > { %v1734_v35 = vadd.f32 1.0, %v1702_v19  ;;  %v3050_v26 = vand.u32 2147483647, %v3041_v1  ;;  %v1667_v60 = vsub.f32 1.0, %v1635_v9  ;;  %v1637_v15 = vmul.f32 %v2145_v18, %v1477_v11 }
 0x261   : > { %v2147_v47 = vpop.eup %2146  ;;  %v1513_v22 = vsub.f32 0.0, %v2988_v38  ;;  %v3054_v52 = vmul.f32 0.70710677, %v3044_v4  ;;  %v3057_v14 = vmul.f32 %v1732_v7, %v2922_v53  ;;  %v1447_v16 = vadd.f32 0.2548296, %v1415_v46  ;;  %v625_v7 = vpop.permute.xlu1 %624  ;;  %v3556_v46 = vld [vmem:[#allocation4_spill] sm:$0xff] }
 0x262   : > { %v3060_v51 = vmul.f32 %v1734_v35, %v2996_v17  ;;  %v1129_v25 = vmul.f32 %v2147_v47, %v1065_v21  ;;  %v1035_v63 = vmul.f32 0.3275911, %v3050_v26  ;;  %v1592_v6 = vmul.f32 1.442695, %v1544_v42 }
 0x263   : > { %3553 = vst [vmem:[#allocation2_spill] sm:$0xff] %v3057_v14  ;;  %v3064_v44 = vand.u32 2147483647, %v3054_v52  ;;  %v3067_v56 = vadd.f32 %v3555_v30, %v620_v20  ;;  %v1352_v53 = vmul.f32 %v1320_v54, %v3011_v0  ;;  %v1699_v17 = vmul.f32 %v1667_v60, %v2901_v32 }
 0x264   : > { %3554 = vst [vmem:[#allocation20_spill] sm:$0xff] %v3060_v51  ;;  %v1161_v40 = vsub.f32 2.0, %v1129_v25  ;;  %v1067_v43 = vadd.f32 1.0, %v1035_v63  ;;  %v1669_v21 = vsub.f32 1.0, %v1637_v15  ;;  %v3076_v3 = vsel %vm935_vm0, 1.0, %v3539_v50 }
 0x265   : > { %v1036_v8 = vmul.f32 0.3275911, %v3064_v44  ;;  %v3080_v59 = vmul.f32 0.5, %v2913_v36  ;;  %v1545_v20 = vmul.f32 %v1513_v22, %v2988_v38  ;;  %v3086_v9 = vmul.f32 %v1729_v41, %v2836_v2 }
 0x266   : > { %v3082_v61 = vmul.f32 %v2147_v47, %v1161_v40  ;;  %2152 = vrcp.f32 %v1067_v43  ;;  %v3091_v32 = vsel %vm936_vm1, 1.0, %v3539_v50  ;;  %v1479_v36 = vmul.f32 %v1447_v16, %v2968_v13 }
 0x267   : > { %2154 = vpow2.f32 %v1592_v6  ;;  %v1068_v10 = vadd.f32 1.0, %v1036_v8  ;;  %v2149_v11 = vpop.eup %2148  ;;  %v1384_v19 = vadd.f32 -0.28449672, %v1352_v53  ;;  %vm937_vm2 = vcmp.ge.f32.partialorder %v2977_v45, 0.0 }
 0x268   : > { %v3096_v38 = vmul.f32 0.70710677, %v3067_v56  ;;  %v1731_v2 = vadd.f32 1.0, %v1699_v17  ;;  %v1701_v18 = vmul.f32 %v1669_v21, %v3006_v23  ;;  %v1225_v62 = vmul.f32 1.0614054, %v3082_v61 }
 0x269   : > { %v2151_v55 = vpop.eup %2150  ;;  %v3101_v42 = vadd.f32 %v3556_v46, %v625_v7  ;;  %v1594_v41 = vmul.f32 1.442695, %v1545_v20  ;;  %v1514_v54 = vsub.f32 0.0, %v3025_v39  ;;  %2156 = vrcp.f32 %v1068_v10 }
 0x26a   : > { %v1130_v35 = vmul.f32 %v2151_v55, %v1066_v29  ;;  %v3105_v13 = vmul.f32 0.5, %v2965_v28  ;;  %v3108_v45 = vsel %vm937_vm2, 1.0, %v3539_v50  ;;  %v3111_v47 = vmul.f32 0.5, %v3000_v37 }
 0x26b   : > { %v3114_v23 = vand.u32 2147483647, %v3096_v38  ;;  %v1639_v60 = vmul.f32 %v2149_v11, %v1479_v36  ;;  %v1416_v15 = vmul.f32 %v1384_v19, %v3011_v0  ;;  %vm938_vm3 = vcmp.ge.f32.partialorder %v3018_v58, 0.0 }
 0x26c   : > { %v1162_v29 = vsub.f32 2.0, %v1130_v35  ;;  %v3119_v22 = vmul.f32 %v1731_v2, %v2886_v27  ;;  %v1257_v28 = vadd.f32 -1.4531521, %v1225_v62  ;;  %v3123_v63 = vmul.f32 0.70710677, %v3101_v42  ;;  %v3557_v27 = vld [vmem:[#allocation5_spill] sm:$0xff]  ;;  %v3145_v62 = vpop.permute.xlu0 %629 }
 0x26d   : > { %v1037_v25 = vmul.f32 0.3275911, %v3114_v23  ;;  %v1733_v37 = vadd.f32 1.0, %v1701_v18  ;;  %2158 = vpow2.f32 %v1594_v41  ;;  %v1546_v6 = vmul.f32 %v1514_v54, %v3025_v39 }
 0x26e   : > { %v3125_v16 = vmul.f32 %v2151_v55, %v1162_v29  ;;  %v3129_v30 = vsel %vm938_vm3, 1.0, %v3539_v50  ;;  %v3132_v53 = vand.u32 2147483647, %v3123_v63  ;;  %v3135_v40 = vadd.f32 %v3557_v27, %v625_v7 }
 0x26f   : > { %v1069_v58 = vadd.f32 1.0, %v1037_v25  ;;  %v1671_v21 = vsub.f32 1.0, %v1639_v60  ;;  %v1448_v8 = vadd.f32 0.2548296, %v1416_v15  ;;  %vm939_vm4 = vcmp.ge.f32.partialorder %v3041_v1, 0.0  ;;  %v3558_v15 = vld [vmem:[#allocation6_spill] sm:$0xff] }
 0x270   : > { %v2153_v17 = vpop.eup %2152  ;;  %v1226_v20 = vmul.f32 1.0614054, %v3125_v16  ;;  %v1289_v39 = vmul.f32 %v1257_v28, %v3082_v61  ;;  %v1038_v19 = vmul.f32 0.3275911, %v3132_v53  ;;  %v1596_v2 = vmul.f32 1.442695, %v1546_v6 }
 0x271   : > { %v2155_v11 = vpop.eup %2154  ;;  %v1131_v36 = vmul.f32 %v2153_v17, %v1067_v43  ;;  %2160 = vrcp.f32 %v1069_v58  ;;  %v3142_v18 = vmul.f32 0.5, %v3028_v34  ;;  %v1515_v7 = vsub.f32 0.0, %v3050_v26 }
 0x272   : > { %v1258_v55 = vadd.f32 -1.4531521, %v1226_v20  ;;  %v3148_v46 = vsel %vm939_vm4, 1.0, %v3539_v50  ;;  %v1070_v41 = vadd.f32 1.0, %v1038_v19  ;;  %v3151_v35 = vmul.f32 0.70710677, %v3135_v40 }
 0x273   : > { %v1163_v1 = vsub.f32 2.0, %v1131_v36  ;;  %v2157_v43 = vpop.eup %2156  ;;  %v1703_v54 = vmul.f32 %v1671_v21, %v3076_v3  ;;  %v1480_v60 = vmul.f32 %v1448_v8, %v3011_v0  ;;  %v3158_v29 = vadd.f32 %v3558_v15, %v3145_v62 }
 0x274   : > { %v1290_v34 = vmul.f32 %v1258_v55, %v3125_v16  ;;  %v1321_v28 = vadd.f32 1.4214138, %v1289_v39  ;;  %v1132_v6 = vmul.f32 %v2157_v43, %v1068_v10  ;;  %2162 = vrcp.f32 %v1070_v41 }
 0x275   : > { %v3160_v25 = vmul.f32 %v2153_v17, %v1163_v1  ;;  %2164 = vpow2.f32 %v1596_v2  ;;  %v1547_v20 = vmul.f32 %v1515_v7, %v3050_v26  ;;  %v3164_v36 = vmul.f32 0.5, %v3044_v4 }
 0x276   : > { %v1322_v27 = vadd.f32 1.4214138, %v1290_v34  ;;  %vm940_vm5 = vcmp.ge.f32.partialorder %v3054_v52, 0.0  ;;  %v1164_v3 = vsub.f32 2.0, %v1132_v6  ;;  %v3169_v21 = vand.u32 2147483647, %v3151_v35 }
 0x277   : > { %v1227_v0 = vmul.f32 1.0614054, %v3160_v25  ;;  %v3171_v8 = vpop.eup %2158  ;;  %v1735_v17 = vadd.f32 1.0, %v1703_v54  ;;  %v1516_v39 = vsub.f32 0.0, %v3064_v44  ;;  %v3176_v26 = vmul.f32 0.70710677, %v3158_v29 }
 0x278   : > { %v1354_v10 = vmul.f32 %v1322_v27, %v3125_v16  ;;  %v1640_v4 = vmul.f32 %v2155_v11, %v1480_v60  ;;  %v1353_v19 = vmul.f32 %v1321_v28, %v3082_v61  ;;  %v3179_v55 = vmul.f32 %v2157_v43, %v1164_v3 }
 0x279   : > { %v1039_v2 = vmul.f32 0.3275911, %v3169_v21  ;;  %v3183_v7 = vmul.f32 %v1733_v37, %v2961_v33  ;;  %v1598_v34 = vmul.f32 1.442695, %v1547_v20  ;;  %v3186_v54 = vand.u32 2147483647, %v3176_v26 }
 0x27a   : > { %v1386_v1 = vadd.f32 -0.28449672, %v1354_v10  ;;  %v1259_v6 = vadd.f32 -1.4531521, %v1227_v0  ;;  %v3191_v11 = vsel %vm940_vm5, 1.0, %v3539_v50  ;;  %v3195_v28 = vmul.f32 %v1735_v17, %v3014_v49 }
 0x27b   : > { %v2161_v15 = vpop.eup %2160  ;;  %v1228_v43 = vmul.f32 1.0614054, %v3179_v55  ;;  %v1071_v60 = vadd.f32 1.0, %v1039_v2  ;;  %v1548_v37 = vmul.f32 %v1516_v39, %v3064_v44  ;;  %v1672_v20 = vsub.f32 1.0, %v1640_v4 }
 0x27c   : > { %v1418_v33 = vmul.f32 %v1386_v1, %v3125_v16  ;;  %v1133_v27 = vmul.f32 %v2161_v15, %v1069_v58  ;;  %v1385_v3 = vadd.f32 -0.28449672, %v1353_v19  ;;  %v3200_v52 = vmul.f32 0.5, %v3067_v56 }
 0x27d   : > { %v1260_v10 = vadd.f32 -1.4531521, %v1228_v43  ;;  %2166 = vrcp.f32 %v1071_v60  ;;  %v1040_v57 = vmul.f32 0.3275911, %v3186_v54  ;;  %v1291_v49 = vmul.f32 %v1259_v6, %v3160_v25 }
 0x27e   : > { %v1450_v0 = vadd.f32 0.2548296, %v1418_v33  ;;  %v1165_v48 = vsub.f32 2.0, %v1133_v27  ;;  %v2163_v2 = vpop.eup %2162  ;;  %2168 = vpow2.f32 %v1598_v34  ;;  %v1518_v44 = vsub.f32 0.0, %v3132_v53 }
 0x27f   : > { %v1292_v17 = vmul.f32 %v1260_v10, %v3179_v55  ;;  %v2165_v58 = vpop.eup %2164  ;;  %v1600_v4 = vmul.f32 1.442695, %v1548_v37  ;;  %v1134_v1 = vmul.f32 %v2163_v2, %v1070_v41  ;;  %v1704_v56 = vmul.f32 %v1672_v20, %v3091_v32 }
 0x280   : > { %v1482_v39 = vmul.f32 %v1450_v0, %v3125_v16  ;;  %v3207_v19 = vmul.f32 %v2161_v15, %v1165_v48  ;;  %v1072_v33 = vadd.f32 1.0, %v1040_v57  ;;  %v3212_v27 = vadd.f32 %v2679_v31, %v3145_v62 }
 0x281   : > { %v1324_v43 = vadd.f32 1.4214138, %v1292_v17  ;;  %v1417_v34 = vmul.f32 %v1385_v3, %v3082_v61  ;;  %v1166_v14 = vsub.f32 2.0, %v1134_v1  ;;  %v1323_v51 = vadd.f32 1.4214138, %v1291_v49 }
 0x282   : > { %v1642_v6 = vmul.f32 %v2165_v58, %v1482_v39  ;;  %v1229_v10 = vmul.f32 1.0614054, %v3207_v19  ;;  %v1550_v48 = vmul.f32 %v1518_v44, %v3132_v53  ;;  %2170 = vrcp.f32 %v1072_v33 }
 0x283   : > { %v1356_v16 = vmul.f32 %v1324_v43, %v3179_v55  ;;  %vm941_vm6 = vcmp.ge.f32.partialorder %v3096_v38, 0.0  ;;  %v3219_v32 = vmul.f32 %v2163_v2, %v1166_v14  ;;  %v1736_v31 = vadd.f32 1.0, %v1704_v56 }
 0x284   : > { %v1674_v41 = vsub.f32 1.0, %v1642_v6  ;;  %v1261_v57 = vadd.f32 -1.4531521, %v1229_v10  ;;  %2172 = vpow2.f32 %v1600_v4  ;;  %v3222_v15 = vmul.f32 0.70710677, %v3212_v27 }
 0x285   : > { %v1388_v62 = vadd.f32 -0.28449672, %v1356_v16  ;;  %v1449_v37 = vadd.f32 0.2548296, %v1417_v34  ;;  %v1230_v53 = vmul.f32 1.0614054, %v3219_v32  ;;  %v1355_v49 = vmul.f32 %v1323_v51, %v3160_v25 }
 0x286   : > { %v1706_v20 = vmul.f32 %v1674_v41, %v3129_v30  ;;  %v1293_v3 = vmul.f32 %v1261_v57, %v3207_v19  ;;  %v1604_v14 = vmul.f32 1.442695, %v1550_v48  ;;  %v3230_v2 = vand.u32 2147483647, %v3222_v15  ;;  %v635_v41 = vpop.permute.xlu1 %634 }
 0x287   : > { %v2167_v0 = vpop.eup %2166  ;;  %v1420_v17 = vmul.f32 %v1388_v62, %v3179_v55  ;;  %v3233_v58 = vmul.f32 0.5, %v3101_v42  ;;  %v1262_v39 = vadd.f32 -1.4531521, %v1230_v53  ;;  %v3238_v1 = vmul.f32 %v1736_v31, %v3080_v59  ;;  %v3559_v53 = vld [vmem:[#allocation7_spill] sm:$0xff] }
 0x288   : > { %v1738_v44 = vadd.f32 1.0, %v1706_v20  ;;  %v1135_v4 = vmul.f32 %v2167_v0, %v1071_v60  ;;  %v3235_v30 = vpop.eup %2168  ;;  %v1517_v51 = vsub.f32 0.0, %v3114_v23  ;;  %v1041_v43 = vmul.f32 0.3275911, %v3230_v2 }
 0x289   : > { %v1452_v56 = vadd.f32 0.2548296, %v1420_v17  ;;  %v1325_v6 = vadd.f32 1.4214138, %v1293_v3  ;;  %v1294_v10 = vmul.f32 %v1262_v39, %v3219_v32  ;;  %v1481_v16 = vmul.f32 %v1449_v37, %v3082_v61 }
 0x28a   : > { %v3243_v34 = vmul.f32 %v1738_v44, %v3111_v47  ;;  %v1167_v42 = vsub.f32 2.0, %v1135_v4  ;;  %v1387_v60 = vadd.f32 -0.28449672, %v1355_v49  ;;  %2174 = vpow2.f32 %v1604_v14 }
 0x28b   : > { %v1073_v48 = vadd.f32 1.0, %v1041_v43  ;;  %v1484_v57 = vmul.f32 %v1452_v56, %v3179_v55  ;;  %v1326_v31 = vadd.f32 1.4214138, %v1294_v10  ;;  %v1549_v20 = vmul.f32 %v1517_v51, %v3114_v23 }
 0x28c   : > { %v3250_v62 = vmul.f32 %v2167_v0, %v1167_v42  ;;  %v2171_v47 = vpop.eup %2170  ;;  %v1519_v3 = vsub.f32 0.0, %v3169_v21  ;;  %v3255_v61 = vadd.f32 %v3559_v53, %v635_v41  ;;  %v1357_v37 = vmul.f32 %v1325_v6, %v3207_v19 }
 0x28d   : > { %2176 = vrcp.f32 %v1073_v48  ;;  %v1358_v49 = vmul.f32 %v1326_v31, %v3219_v32  ;;  %v1136_v14 = vmul.f32 %v2171_v47, %v1072_v33  ;;  %v1641_v0 = vmul.f32 %v3171_v8, %v1481_v16  ;;  %v3560_v8 = vld [vmem:[#allocation8_spill] sm:$0xff] }
 0x28e   : > { %v1231_v17 = vmul.f32 1.0614054, %v3250_v62  ;;  %v2173_v55 = vpop.eup %2172  ;;  %v1419_v44 = vmul.f32 %v1387_v60, %v3160_v25  ;;  %v3265_v23 = vsel %vm941_vm6, 1.0, %v3539_v50  ;;  %v3268_v39 = vmul.f32 0.5, %v3135_v40 }
 0x28f   : > { %v1644_v4 = vmul.f32 %v2173_v55, %v1484_v57  ;;  %vm942_vm7 = vcmp.ge.f32.partialorder %v3123_v63, 0.0  ;;  %v1390_v56 = vadd.f32 -0.28449672, %v1358_v49  ;;  %v1602_v43 = vmul.f32 1.442695, %v1549_v20 }
 0x290   : > { %v1263_v51 = vadd.f32 -1.4531521, %v1231_v17  ;;  %v1551_v33 = vmul.f32 %v1519_v3, %v3169_v21  ;;  %v1168_v6 = vsub.f32 2.0, %v1136_v14  ;;  %v3273_v10 = vadd.f32 %v3560_v8, %v635_v41 }
 0x291   : > { %v1389_v42 = vadd.f32 -0.28449672, %v1357_v37  ;;  %v1422_v38 = vmul.f32 %v1390_v56, %v3219_v32  ;;  %v3278_v40 = vmul.f32 0.70710677, %v3255_v61  ;;  %v1673_v60 = vsub.f32 1.0, %v1641_v0 }
 0x292   : > { %v1295_v16 = vmul.f32 %v1263_v51, %v3250_v62  ;;  %v1451_v57 = vadd.f32 0.2548296, %v1419_v44  ;;  %v974_v63 = vsel %vm942_vm7, 1.0, %v3539_v50  ;;  %v3281_v31 = vmul.f32 %v2171_v47, %v1168_v6 }
 0x293   : > { %v1676_v20 = vsub.f32 1.0, %v1644_v4  ;;  %v1454_v21 = vadd.f32 0.2548296, %v1422_v38  ;;  %v3284_v41 = vmul.f32 0.5, %v3158_v29  ;;  %2178 = vpow2.f32 %v1602_v43 }
 0x294   : > { %v1327_v3 = vadd.f32 1.4214138, %v1295_v16  ;;  %v2175_v53 = vpop.eup %2174  ;;  %v1232_v37 = vmul.f32 1.0614054, %v3281_v31  ;;  %v3288_v49 = vand.u32 2147483647, %v3278_v40  ;;  %v1421_v14 = vmul.f32 %v1389_v42, %v3207_v19 }
 0x295   : > { %v3291_v17 = vmul.f32 0.70710677, %v3273_v10  ;;  %v1486_v47 = vmul.f32 %v1454_v21, %v3219_v32  ;;  %v1606_v0 = vmul.f32 1.442695, %v1551_v33  ;;  %v1705_v29 = vmul.f32 %v1673_v60, %v3108_v45 }
 0x296   : > { %v1359_v55 = vmul.f32 %v1327_v3, %v3250_v62  ;;  %v1264_v4 = vadd.f32 -1.4531521, %v1232_v37  ;;  %v1520_v56 = vsub.f32 0.0, %v3186_v54  ;;  %v1042_v51 = vmul.f32 0.3275911, %v3288_v49 }
 0x297   : > { %v2177_v44 = vpop.eup %2176  ;;  %v1708_v43 = vmul.f32 %v1676_v20, %v3191_v11  ;;  %v1646_v6 = vmul.f32 %v2175_v53, %v1486_v47  ;;  %v1483_v42 = vmul.f32 %v1451_v57, %v3160_v25  ;;  %v3303_v33 = vand.u32 2147483647, %v3291_v17  ;;  %v640_v53 = vpop.permute.xlu0 %639 }
 0x298   : > { %v1391_v8 = vadd.f32 -0.28449672, %v1359_v55  ;;  %v1137_v38 = vmul.f32 %v2177_v44, %v1073_v48  ;;  %v1296_v32 = vmul.f32 %v1264_v4, %v3281_v31  ;;  %v1074_v16 = vadd.f32 1.0, %v1042_v51 }
 0x299   : > { %v1453_v21 = vadd.f32 0.2548296, %v1421_v14  ;;  %v1678_v45 = vsub.f32 1.0, %v1646_v6  ;;  %2180 = vpow2.f32 %v1606_v0  ;;  %v1043_v11 = vmul.f32 0.3275911, %v3303_v33  ;;  %v3561_v6 = vld [vmem:[#allocation11_spill] sm:$0xff] }
 0x29a   : > { %v1169_v60 = vsub.f32 2.0, %v1137_v38  ;;  %v1423_v3 = vmul.f32 %v1391_v8, %v3250_v62  ;;  %v1328_v37 = vadd.f32 1.4214138, %v1296_v32  ;;  %2182 = vrcp.f32 %v1074_v16 }
 0x29b   : > { %v1740_v20 = vadd.f32 1.0, %v1708_v43  ;;  %v1710_v48 = vmul.f32 %v1678_v45, %v974_v63  ;;  %v1552_v25 = vmul.f32 %v1520_v56, %v3186_v54  ;;  %v1737_v47 = vadd.f32 1.0, %v1705_v29 }
 0x29c   : > { %v3308_v57 = vmul.f32 %v2177_v44, %v1169_v60  ;;  %v1643_v55 = vmul.f32 %v3235_v30, %v1483_v42  ;;  %vm943_vm8 = vcmp.ge.f32.partialorder %v3151_v35, 0.0  ;;  %v1075_v14 = vadd.f32 1.0, %v1043_v11  ;;  %v3562_v44 = vld [vmem:[#allocation12_spill] sm:$0xff] }
 0x29d   : > { %v1485_v0 = vmul.f32 %v1453_v21, %v3207_v19  ;;  %v1742_v4 = vadd.f32 1.0, %v1710_v48  ;;  %v3315_v8 = vadd.f32 %v3561_v6, %v640_v53  ;;  %v2179_v63 = vpop.eup %2178  ;;  %v1455_v43 = vadd.f32 0.2548296, %v1423_v3 }
 0x29e   : > { %v1233_v51 = vmul.f32 1.0614054, %v3308_v57  ;;  %v1360_v54 = vmul.f32 %v1328_v37, %v3281_v31  ;;  %2184 = vrcp.f32 %v1075_v14  ;;  %v3319_v29 = vadd.f32 %v3562_v44, %v640_v53 }
 0x29f   : > { %v3322_v30 = vmul.f32 %v1740_v20, %v3164_v36  ;;  %v3325_v56 = vmul.f32 %v1742_v4, %v3233_v58  ;;  %v1608_v19 = vmul.f32 1.442695, %v1552_v25  ;;  %v1675_v42 = vsub.f32 1.0, %v1643_v55 }
 0x2a0   : > { %3563 = vst [vmem:[#allocation3_spill] sm:$0xff] %v3319_v29  ;;  %v1265_v38 = vadd.f32 -1.4531521, %v1233_v51  ;;  %v975_v32 = vsel %vm943_vm8, 1.0, %v3539_v50  ;;  %vm944_vm9 = vcmp.ge.f32.partialorder %v3176_v26, 0.0  ;;  %v1521_v58 = vsub.f32 0.0, %v3230_v2 }
 0x2a1   : > { %v3332_v21 = vmul.f32 0.70710677, %v3315_v8  ;;  %v3339_v60 = vmul.f32 0.70710677, %v3319_v29  ;;  %v1645_v3 = vmul.f32 %v2179_v63, %v1485_v0  ;;  %v1487_v37 = vmul.f32 %v1455_v43, %v3250_v62 }
 0x2a2   : > { %v1297_v36 = vmul.f32 %v1265_v38, %v3308_v57  ;;  %v1392_v35 = vadd.f32 -0.28449672, %v1360_v54  ;;  %v3346_v20 = vmul.f32 %v1737_v47, %v3105_v13  ;;  %v3349_v48 = vsel %vm944_vm9, 1.0, %v3539_v50 }
 0x2a3   : > { %v3343_v11 = vand.u32 2147483647, %v3332_v21  ;;  %v2181_v26 = vpop.eup %2180  ;;  %2186 = vpow2.f32 %v1608_v19  ;;  %v1707_v55 = vmul.f32 %v1675_v42, %v3148_v46  ;;  %vm945_vm10 = vcmp.ge.f32.partialorder %v3222_v15, 0.0  ;;  %v645_v46 = vpop.permute.xlu1 %644 }
 0x2a4   : > { %v1329_v25 = vadd.f32 1.4214138, %v1297_v36  ;;  %v2183_v53 = vpop.eup %2182  ;;  %v1522_v62 = vsub.f32 0.0, %v3288_v49  ;;  %v1553_v51 = vmul.f32 %v1521_v58, %v3230_v2  ;;  %v3358_v47 = vand.u32 2147483647, %v3339_v60  ;;  %v3564_v36 = vld [vmem:[#allocation15_spill] sm:$0xff] }
 0x2a5   : > { %v1044_v0 = vmul.f32 0.3275911, %v3343_v11  ;;  %v1138_v13 = vmul.f32 %v2183_v53, %v1074_v16  ;;  %v1677_v6 = vsub.f32 1.0, %v1645_v3  ;;  %v1647_v63 = vmul.f32 %v2181_v26, %v1487_v37 }
 0x2a6   : > { %v1361_v4 = vmul.f32 %v1329_v25, %v3308_v57  ;;  %v1424_v43 = vmul.f32 %v1392_v35, %v3281_v31  ;;  %v3362_v15 = vsel %vm945_vm10, 1.0, %v3539_v50  ;;  %v1523_v19 = vsub.f32 0.0, %v3303_v33 }
 0x2a7   : > { %v1076_v54 = vadd.f32 1.0, %v1044_v0  ;;  %v1170_v44 = vsub.f32 2.0, %v1138_v13  ;;  %v1045_v38 = vmul.f32 0.3275911, %v3358_v47  ;;  %v1554_v16 = vmul.f32 %v1522_v62, %v3288_v49 }
 0x2a8   : > { %v2185_v42 = vpop.eup %2184  ;;  %v1393_v2 = vadd.f32 -0.28449672, %v1361_v4  ;;  %v3368_v58 = vadd.f32 %v3564_v36, %v645_v46  ;;  %v1610_v3 = vmul.f32 1.442695, %v1553_v51  ;;  %v1739_v25 = vadd.f32 1.0, %v1707_v55 }
 0x2a9   : > { %2188 = vrcp.f32 %v1076_v54  ;;  %v3370_v37 = vmul.f32 %v2183_v53, %v1170_v44  ;;  %v1139_v35 = vmul.f32 %v2185_v42, %v1075_v14  ;;  %v1077_v26 = vadd.f32 1.0, %v1045_v38  ;;  %v3565_v53 = vld [vmem:[#allocation18_spill] sm:$0xff] }
 0x2aa   : > { %v1709_v0 = vmul.f32 %v1677_v6, %v3265_v23  ;;  %v1679_v13 = vsub.f32 1.0, %v1647_v63  ;;  %v1456_v45 = vadd.f32 0.2548296, %v1424_v43  ;;  %v1555_v4 = vmul.f32 %v1523_v19, %v3303_v33  ;;  %v3566_v63 = vld [vmem:[#allocation16_spill] sm:$0xff]  ;;  %v3567_v43 = vld [vmem:[#allocation17_spill] sm:$0xff] }
 0x2ab   : > { %v1234_v59 = vmul.f32 1.0614054, %v3370_v37  ;;  %v1171_v29 = vsub.f32 2.0, %v1139_v35  ;;  %2190 = vrcp.f32 %v1077_v26  ;;  %v1425_v49 = vmul.f32 %v1393_v2, %v3308_v57 }
 0x2ac   : > { %v1612_v62 = vmul.f32 1.442695, %v1554_v16  ;;  %v3377_v51 = vmul.f32 0.70710677, %v3368_v58  ;;  %v3380_v14 = vadd.f32 %v3565_v53, %v645_v46  ;;  %2192 = vpow2.f32 %v1610_v3  ;;  %v3569_v3 = vld [vmem:[#allocation9_spill] sm:$0xff] }
 0x2ad   : > { %v2187_v55 = vpop.eup %2186  ;;  %v1266_v23 = vadd.f32 -1.4531521, %v1234_v59  ;;  %v3382_v6 = vmul.f32 %v2185_v42, %v1171_v29  ;;  %v2021_v44 = vpack.c.bf16 %v3567_v43, %v3566_v63  ;;  %v3387_v33 = vmul.f32 %v1739_v25, %v3142_v18 }
 0x2ae   : > { %v1711_v19 = vmul.f32 %v1679_v13, %v975_v32  ;;  %v1488_v38 = vmul.f32 %v1456_v45, %v3281_v31  ;;  %v3391_v2 = vand.u32 2147483647, %v3377_v51  ;;  %v1741_v16 = vadd.f32 1.0, %v1709_v0  ;;  %v3568_v32 = vld [vmem:[#allocation10_spill] sm:$0xff]  ;;  %v3571_v0 = vld [vmem:[#allocation19_spill] sm:$0xff] }
 0x2af   : > { %v1298_v46 = vmul.f32 %v1266_v23, %v3370_v37  ;;  %v1235_v36 = vmul.f32 1.0614054, %v3382_v6  ;;  %v1614_v59 = vmul.f32 1.442695, %v1555_v4  ;;  %2022 = vmatprep.subr.bf16.mxu0 %v2021_v44  ;;  %v1457_v29 = vadd.f32 0.2548296, %v1425_v49 }
 0x2b0   : > { %2194 = vpow2.f32 %v1612_v62  ;;  %v1046_v42 = vmul.f32 0.3275911, %v3391_v2  ;;  %v3397_v18 = vmul.f32 0.70710677, %v3380_v14  ;;  %v3570_v31 = vpack.c.bf16 %v3568_v32, %v3569_v3 }
 0x2b1   : > { %vm946_vm11 = vcmp.ge.f32.partialorder %v3278_v40, 0.0  ;;  %v1330_v45 = vadd.f32 1.4214138, %v1298_v46  ;;  %v1267_v35 = vadd.f32 -1.4531521, %v1235_v36  ;;  %v1524_v25 = vsub.f32 0.0, %v3343_v11 }
 0x2b2   : > { %2024 = vmatpush1.bf16.msra.mxu0 %v3570_v31  ;;  %v2025_v13 = vpack.c.bf16 %v2946_v5, %v3571_v0  ;;  %v1743_v49 = vadd.f32 1.0, %v1711_v19  ;;  %v1648_v62 = vmul.f32 %v2187_v55, %v1488_v38  ;;  %v3406_v53 = vadd.f32 1.0, %v1046_v42  ;;  %v3572_v19 = vld [vmem:[#allocation14_spill] sm:$0xff]  ;;  %v3573_v38 = vld [vmem:[#allocation13_spill] sm:$0xff] }
 0x2b3   : > { %v2189_v4 = vpop.eup %2188  ;;  %v3409_v23 = vand.u32 2147483647, %v3397_v18  ;;  %v1362_v63 = vmul.f32 %v1330_v45, %v3370_v37  ;;  %v1299_v43 = vmul.f32 %v1267_v35, %v3382_v6  ;;  %2196 = vpow2.f32 %v1614_v59 }
 0x2b4   : > { %v1140_v44 = vmul.f32 %v2189_v4, %v1076_v54  ;;  %2026 = vmatprep.subr.bf16.mxu0 %v2025_v13  ;;  %v3414_v46 = vmul.f32 %v1741_v16, %v3200_v52  ;;  %v1489_v5 = vmul.f32 %v1457_v29, %v3308_v57  ;;  %2198 = vrcp.f32 %v3406_v53 }
 0x2b5   : > { %v1047_v55 = vmul.f32 0.3275911, %v3409_v23  ;;  %v3574_v36 = vpack.c.bf16 %v3572_v19, %v3573_v38  ;;  %v2191_v42 = vpop.eup %2190  ;;  %v1394_v32 = vadd.f32 -0.28449672, %v1362_v63  ;;  %v1331_v3 = vadd.f32 1.4214138, %v1299_v43 }
 0x2b6   : > { %v1172_v31 = vsub.f32 2.0, %v1140_v44  ;;  %v1556_v54 = vmul.f32 %v1524_v25, %v3343_v11  ;;  %v3424_v59 = vmul.f32 %v1743_v49, %v3268_v39  ;;  %v1680_v52 = vsub.f32 1.0, %v1648_v62  ;;  %v2193_v29 = vpop.eup %2192 }
 0x2b7   : > { %2028 = vmatpush1.bf16.msra.mxu0 %v3574_v36  ;;  %v1141_v16 = vmul.f32 %v2191_v42, %v1077_v26  ;;  %v3426_v57 = vadd.f32 1.0, %v1047_v55  ;;  %v1426_v45 = vmul.f32 %v1394_v32, %v3370_v37  ;;  %v1363_v35 = vmul.f32 %v1331_v3, %v3382_v6 }
 0x2b8   : > { %v3430_v0 = vmul.f32 %v2189_v4, %v1172_v31  ;;  %v1525_v13 = vsub.f32 0.0, %v3358_v47  ;;  %v1649_v63 = vmul.f32 %v2193_v29, %v1489_v5  ;;  %v2029_v39 = vpack.c.bf16 %v3119_v22, %v3086_v9 }
 0x2b9   : > { %v1173_v43 = vsub.f32 2.0, %v1141_v16  ;;  %2200 = vrcp.f32 %v3426_v57  ;;  %v1458_v11 = vadd.f32 0.2548296, %v1426_v45  ;;  %v1395_v26 = vadd.f32 -0.28449672, %v1363_v35  ;;  %v3577_v16 = vld [vmem:[#allocation2_spill] sm:$0xff] }
 0x2ba   : > { %v1236_v25 = vmul.f32 1.0614054, %v3430_v0  ;;  %v2033_v49 = vpack.c.bf16 %v3195_v28, %v3183_v7  ;;  %v2195_v62 = vpop.eup %2194  ;;  %v1712_v4 = vmul.f32 %v1680_v52, %v3349_v48  ;;  %2030 = vmatprep.subr.bf16.mxu0 %v2029_v39  ;;  %v2037_v5 = vpack.c.bf16 %v3387_v33, %v3346_v20  ;;  %v3576_v52 = vld [vmem:[#allocation20_spill] sm:$0xff] }
 0x2bb   : > { %v3440_v44 = vmul.f32 %v2191_v42, %v1173_v43  ;;  %v2041_v55 = vpack.c.bf16 %v3424_v59, %v3414_v46  ;;  %v882_v9 = vmul.f32 0.5, %v3255_v61  ;;  %v1490_v22 = vmul.f32 %v1458_v11, %v3370_v37 }
 0x2bc   : > { %v1427_v19 = vmul.f32 %v1395_v26, %v3382_v6  ;;  %v1268_v38 = vadd.f32 -1.4531521, %v1236_v25  ;;  %v3575_v7 = vpack.c.bf16 %v2983_v24, %v2980_v12  ;;  %v1681_v28 = vsub.f32 1.0, %v1649_v63 }
 0x2bd   : > { %v978_v48 = vsel %vm946_vm11, 1.0, %v3539_v50  ;;  %v1616_v20 = vmul.f32 1.442695, %v1556_v54  ;;  %v1237_v33 = vmul.f32 1.0614054, %v3440_v44  ;;  %v2197_v46 = vpop.eup %2196  ;;  %v1650_v61 = vmul.f32 %v2195_v62, %v1490_v22 }
 0x2be   : > { %2032 = vmatpush1.bf16.msra.mxu0 %v3575_v7  ;;  %vm947_vm12 = vcmp.ge.f32.partialorder %v3291_v17, 0.0  ;;  %v1459_v37 = vadd.f32 0.2548296, %v1427_v19  ;;  %v1300_v36 = vmul.f32 %v1268_v38, %v3430_v0  ;;  %v2199_v42 = vpop.eup %2198  ;;  %v1744_v32 = vadd.f32 1.0, %v1712_v4 }
 0x2bf   : > { %2034 = vmatprep.subr.bf16.mxu0 %v2033_v49  ;;  %v1269_v12 = vadd.f32 -1.4531521, %v1237_v33  ;;  %v1557_v24 = vmul.f32 %v1525_v13, %v3358_v47  ;;  %v1526_v3 = vsub.f32 0.0, %v3391_v2  ;;  %v1682_v40 = vsub.f32 1.0, %v1650_v61 }
 0x2c0   : > { %v1491_v31 = vmul.f32 %v1459_v37, %v3382_v6  ;;  %v1332_v54 = vadd.f32 1.4214138, %v1300_v36  ;;  %v1142_v59 = vmul.f32 %v2199_v42, %v3406_v53  ;;  %v3578_v29 = vpack.c.bf16 %v3576_v52, %v3577_v16 }
 0x2c1   : > { %v1713_v17 = vmul.f32 %v1681_v28, %v3362_v15  ;;  %v979_v45 = vsel %vm947_vm12, 1.0, %v3539_v50  ;;  %2202 = vpow2.f32 %v1616_v20  ;;  %v1301_v35 = vmul.f32 %v1269_v12, %v3440_v44 }
 0x2c2   : > { %2036 = vmatpush1.bf16.msra.mxu0 %v3578_v29  ;;  %v1714_v47 = vmul.f32 %v1682_v40, %v978_v48  ;;  %v1651_v13 = vmul.f32 %v2197_v46, %v1491_v31  ;;  %v1364_v63 = vmul.f32 %v1332_v54, %v3430_v0  ;;  %v1174_v6 = vsub.f32 2.0, %v1142_v59 }
 0x2c3   : > { %2038 = vmatprep.subr.bf16.mxu0 %v2037_v5  ;;  %v2201_v43 = vpop.eup %2200  ;;  %v1776_v53 = vmul.f32 %v1744_v32, %v3284_v41  ;;  %v1333_v39 = vadd.f32 1.4214138, %v1301_v35  ;;  %v1618_v11 = vmul.f32 1.442695, %v1557_v24  ;;  %v1558_v26 = vmul.f32 %v1526_v3, %v3391_v2 }
 0x2c4   : > { %v1746_v25 = vadd.f32 1.0, %v1714_v47  ;;  %v1683_v15 = vsub.f32 1.0, %v1651_v13  ;;  %v1396_v49 = vadd.f32 -0.28449672, %v1364_v63  ;;  %v1206_v62 = vmul.f32 %v2199_v42, %v1174_v6 }
 0x2c5   : > { %v3579_v4 = vpack.c.bf16 %v3243_v34, %v3238_v1  ;;  %v1745_v5 = vadd.f32 1.0, %v1713_v17  ;;  %v1365_v22 = vmul.f32 %v1333_v39, %v3440_v44  ;;  %v1143_v19 = vmul.f32 %v2201_v43, %v3426_v57 }
 0x2c6   : > { %v1527_v38 = vsub.f32 0.0, %v3409_v23  ;;  %v1778_v41 = vmul.f32 %v1746_v25, %v882_v9  ;;  %v1715_v7 = vmul.f32 %v1683_v15, %v979_v45  ;;  %v1428_v2 = vmul.f32 %v1396_v49, %v3430_v0 }
 0x2c7   : > { %2040 = vmatpush1.bf16.msra.mxu0 %v3579_v4  ;;  %v1238_v28 = vmul.f32 1.0614054, %v1206_v62  ;;  %v881_v48 = vmul.f32 0.5, %v3212_v27  ;;  %v883_v20 = vmul.f32 0.5, %v3273_v10  ;;  %v1397_v33 = vadd.f32 -0.28449672, %v1365_v22 }
 0x2c8   : > { %2042 = vmatprep.subr.bf16.mxu0 %v2041_v55  ;;  %v1175_v1 = vsub.f32 2.0, %v1143_v19  ;;  %v2047_v34 = vpack.c.bf16 %v1778_v41, %v1776_v53  ;;  %v1747_v46 = vadd.f32 1.0, %v1715_v7  ;;  %v1460_v61 = vadd.f32 0.2548296, %v1428_v2 }
 0x2c9   : > { %v1270_v37 = vadd.f32 -1.4531521, %v1238_v28  ;;  %v3580_v57 = vpack.c.bf16 %v3325_v56, %v3322_v30  ;;  %v1429_v55 = vmul.f32 %v1397_v33, %v3440_v44  ;;  %2204 = vpow2.f32 %v1618_v11 }
 0x2ca   : > { %v1620_v9 = vmul.f32 1.442695, %v1558_v26  ;;  %v1207_v36 = vmul.f32 %v2201_v43, %v1175_v1  ;;  %v1777_v42 = vmul.f32 %v1745_v5, %v881_v48  ;;  %v1779_v32 = vmul.f32 %v1747_v46, %v883_v20  ;;  %v3581_v46 = vld [vmem:[#allocation3_spill] sm:$0xff] }
 0x2cb   : > { %2044 = vmatpush1.bf16.msra.mxu0 %v3580_v57  ;;  %v1302_v27 = vmul.f32 %v1270_v37, %v1206_v62  ;;  %v1559_v10 = vmul.f32 %v1527_v38, %v3409_v23  ;;  %v2203_v12 = vpop.eup %2202  ;;  %v1492_v3 = vmul.f32 %v1460_v61, %v3430_v0  ;;  %v1461_v54 = vadd.f32 0.2548296, %v1429_v55 }
 0x2cc   : > { %v1239_v24 = vmul.f32 1.0614054, %v1207_v36  ;;  %v2045_v31 = vpack.c.bf16 %v1779_v32, %v1777_v42  ;;  %2206 = vpow2.f32 %v1620_v9  ;;  %vm948_vm13 = vcmp.ge.f32.partialorder %v3332_v21, 0.0 }
 0x2cd   : > { %v1334_v40 = vadd.f32 1.4214138, %v1302_v27  ;;  %v1622_v59 = vmul.f32 1.442695, %v1559_v10  ;;  %v1652_v16 = vmul.f32 %v2203_v12, %v1492_v3  ;;  %v1493_v17 = vmul.f32 %v1461_v54, %v3440_v44 }
 0x2ce   : > { %v1271_v30 = vadd.f32 -1.4531521, %v1239_v24  ;;  %2046 = vmatprep.subr.bf16.mxu0 %v2045_v31  ;;  %v980_v39 = vsel %vm948_vm13, 1.0, %v3539_v50  ;;  %vm950_vm14 = vcmp.ge.f32.partialorder %v3377_v51, 0.0  ;;  %vm949_vm15 = vcmp.ge.f32.partialorder %v3339_v60, 0.0 }
 0x2cf   : > { %v1366_v56 = vmul.f32 %v1334_v40, %v1206_v62  ;;  %2048 = vmatpush1.bf16.msra.mxu0 %v2047_v34  ;;  %2208 = vpow2.f32 %v1622_v59  ;;  %v1684_v0 = vsub.f32 1.0, %v1652_v16  ;;  %v982_v21 = vsel %vm950_vm14, 1.0, %v3539_v50 }
 0x2d0   : > { %v1303_v52 = vmul.f32 %v1271_v30, %v1207_v36  ;;  %vm951_vm0 = vcmp.ge.f32.partialorder %v3397_v18, 0.0  ;;  %v884_v51 = vmul.f32 0.5, %v3315_v8  ;;  %v886_v7 = vmul.f32 0.5, %v3368_v58  ;;  %v1784_v58 = vld [vmem:[%s3521_s6] sm:$0x1f] }
 0x2d1   : > { %v1398_v29 = vadd.f32 -0.28449672, %v1366_v56  ;;  %v1716_v26 = vmul.f32 %v1684_v0, %v980_v39  ;;  %v983_v20 = vsel %vm951_vm0, 1.0, %v3539_v50  ;;  %v885_v61 = vmul.f32 0.5, %v3581_v46 }
 0x2d2   : > { %v1335_v45 = vadd.f32 1.4214138, %v1303_v52  ;;  %v887_v37 = vmul.f32 0.5, %v3380_v14 }
 0x2d3   : > { %v1430_v23 = vmul.f32 %v1398_v29, %v1206_v62  ;;  %v2205_v35 = vpop.eup %2204  ;;  %v1748_v22 = vadd.f32 1.0, %v1716_v26 }
 0x2d4   : > { %v1367_v47 = vmul.f32 %v1335_v45, %v1207_v36  ;;  %v1653_v63 = vmul.f32 %v2205_v35, %v1493_v17 }
 0x2d5   : > { %v1462_v13 = vadd.f32 0.2548296, %v1430_v23  ;;  %v1780_v28 = vmul.f32 %v1748_v22, %v884_v51 }
 0x2d6   : > { %v1399_v6 = vadd.f32 -0.28449672, %v1367_v47  ;;  %v2207_v53 = vpop.eup %2206  ;;  %v1685_v25 = vsub.f32 1.0, %v1653_v63 }
 0x2d7   : > { %v1494_v43 = vmul.f32 %v1462_v13, %v1206_v62  ;;  %v981_v62 = vsel %vm949_vm15, 1.0, %v3539_v50  ;;  %v1789_v50 = vpop.permute.xlu0 %1788 }
 0x2d8   : > { %v1431_v11 = vmul.f32 %v1399_v6, %v1207_v36  ;;  %v1717_v38 = vmul.f32 %v1685_v25, %v981_v62 }
 0x2d9   : > { %v1654_v44 = vmul.f32 %v2207_v53, %v1494_v43  ;;  %v2209_v5 = vpop.eup %2208 }
 0x2da   : > { %v1463_v15 = vadd.f32 0.2548296, %v1431_v11  ;;  %v1749_v33 = vadd.f32 1.0, %v1717_v38 }
 0x2db   : > { %v1686_v49 = vsub.f32 1.0, %v1654_v44 }
 0x2dc   : > { %v1495_v4 = vmul.f32 %v1463_v15, %v1207_v36  ;;  %v1781_v57 = vmul.f32 %v1749_v33, %v885_v61 }
 0x2dd   : > { %v1718_v19 = vmul.f32 %v1686_v49, %v982_v21 }
 0x2de   : > { %v1655_v41 = vmul.f32 %v2209_v5, %v1495_v4 }
 0x2df   : > { %v1750_v60 = vadd.f32 1.0, %v1718_v19 }
 0x2e0   : > { %v1687_v2 = vsub.f32 1.0, %v1655_v41 }
 0x2e1   : > { %v1782_v48 = vmul.f32 %v1750_v60, %v886_v7 }
 0x2e2   : > { %v1719_v1 = vmul.f32 %v1687_v2, %v983_v20 }
 0x2e3   : > { %v2051_v34 = vpack.c.bf16 %v1782_v48, %v1780_v28 }
 0x2e4   : > { %v1751_v18 = vadd.f32 1.0, %v1719_v1 }
 0x2e6   : > { %v1783_v55 = vmul.f32 %v1751_v18, %v887_v37 }
 0x2e8   : > { %v2049_v8 = vpack.c.bf16 %v1783_v55, %v1781_v57 }
 0x2ea   : > { %2050 = vmatprep.subr.bf16.mxu0 %v2049_v8 }
 0x2eb   : > { %2052 = vmatpush1.bf16.msra.mxu0 %v2051_v34 }
 0x2ee   : > { %1856 = vmatmul.mubr.f32.vlgmr.msra.gmra.mrb[8].mxu0 %v1784_v58 }
 0x3c1   : > { %v1857_v9 = vpop.f32.mrb[8].mxu0 }
 0x3c2   : > { %v1858_v36 = vadd.f32 %v1857_v9, %v1789_v50  ;;  %v1859_v14 = vpop.f32.mrb[9].mxu0 }
 0x3c3   : > { %v1860_v42 = vadd.f32 %v1859_v14, %v1789_v50 }
 0x3c4   : > { %1862 = vst [vmem:[%s379_s15] sm:$0x1f] %v1858_v36 }
 0x3c5   : > { %1863 = vst [vmem:[%s379_s15 + $0x8] sm:$0x1f] %v1860_v42 }
 0x3c6 PF: > { %s18_s29 = sadd.s32 1, %s2232_s29   ;;  %s3582_s27 = smov %s2228_s28 }
 0x3c7   : > { %p15_p5 = scmp.ge.s32.totalorder %s18_s29, 4   ;;  %s3583_s28 = smov %s3585_s30 }
 0x3c9   :  { %17 = sbr.rel (!%p15_p5) target bundleno = 2 (0x2), region = 85 }

</bundles_post_ra>
